<compile_context>
chip_gen: v6e
topology: v6e:2x2x1
jax: 0.10.0
libtpu: 0.0.40
codegen_flags: <defaults>
</compile_context>

<pallas_src>
import math

import jax
import jax.numpy as jnp
from jax.experimental import pallas as pl
from jax.experimental.pallas import tpu as pltpu  # noqa: F401  (TPU backend)


# ---------------------------------------------------------------------------
# Config (small synthetic encoder consistent with the module's forward)
# ---------------------------------------------------------------------------
B = 2           # batch
S = 8           # sequence length
H = 32          # hidden size
NH = 4          # attention heads
HD = H // NH    # head dim
FF = 64         # FFN intermediate size
V = 64          # vocab size
L = 2           # number of transformer layers
PAD_ID = 1      # UniXcoder pad token id (mask = ids != 1)
BS = B * S


# ---------------------------------------------------------------------------
# In-kernel helpers (f32 math)
# ---------------------------------------------------------------------------
def _layernorm(x, gamma, beta, eps=1e-12):
    mu = jnp.mean(x, axis=-1, keepdims=True)
    d = x - mu
    var = jnp.mean(d * d, axis=-1, keepdims=True)
    return d * jax.lax.rsqrt(var + eps) * gamma + beta


def _gelu_tanh(x):
    c = math.sqrt(2.0 / math.pi)
    return 0.5 * x * (1.0 + jnp.tanh(c * (x + 0.044715 * x * x * x)))


# ---------------------------------------------------------------------------
# Fused forward kernel: embedding LN -> L transformer layers -> pool+normalize
# ---------------------------------------------------------------------------
def _fused_forward_kernel(
    x_ref,                    # (BS, H)  f32  word+pos embeddings (pre-LN)
    negmask_ref,              # (B, 1, S) f32 additive key mask (0 / -1e9)
    poolw_ref,                # (B, BS)  f32  masked-mean pooling weights
    emb_g_ref, emb_b_ref,     # (1, H)   f32  embedding LayerNorm
    wqkv_ref, bqkv_ref,       # (L, H, 3H) bf16, (L, 1, 3H) f32
    wo_ref, bo_ref,           # (L, H, H)  bf16, (L, 1, H)  f32
    ln1g_ref, ln1b_ref,       # (L, 1, H)  f32
    w1_ref, b1_ref,           # (L, H, FF) bf16, (L, 1, FF) f32
    w2_ref, b2_ref,           # (L, FF, H) bf16, (L, 1, H)  f32
    ln2g_ref, ln2b_ref,       # (L, 1, H)  f32
    out_ref,                  # (B, H)   f32
):
    scale = 1.0 / math.sqrt(HD)
    neg = negmask_ref[...]                               # (B, 1, S) f32, hoisted

    # --- embedding LayerNorm ---
    x = _layernorm(x_ref[...], emb_g_ref[...], emb_b_ref[...])   # (BS, H) f32

    # --- transformer layers (static unroll, weights resident in VMEM) ---
    for l in range(L):
        # fused QKV projection (bf16 MXU, f32 accumulate)
        qkv = jnp.dot(x.astype(jnp.bfloat16), wqkv_ref[l],
                      preferred_element_type=jnp.float32) + bqkv_ref[l]  # (BS, 3H)
        qkv_b = qkv.reshape(B, S, 3 * H)                 # tile-aligned split of rows

        ctx_parts = []
        for h in range(NH):                              # static head loop
            q = qkv_b[:, :, h * HD:(h + 1) * HD]                     # (B, S, HD)
            k = qkv_b[:, :, H + h * HD:H + (h + 1) * HD]             # (B, S, HD)
            v = qkv_b[:, :, 2 * H + h * HD:2 * H + (h + 1) * HD]     # (B, S, HD)

            s = jnp.einsum('bqd,bkd->bqk',
                           q.astype(jnp.bfloat16), k.astype(jnp.bfloat16),
                           preferred_element_type=jnp.float32) * scale   # (B,S,S)
            s = s + neg                                   # mask padded keys (f32)
            s = s - jnp.max(s, axis=-1, keepdims=True)
            p = jnp.exp(s)
            p = p * pl.reciprocal(jnp.sum(p, axis=-1, keepdims=True), approx=True)
            ctx_parts.append(
                jnp.einsum('bqk,bkd->bqd',
                           p.astype(jnp.bfloat16), v.astype(jnp.bfloat16),
                           preferred_element_type=jnp.float32))          # (B,S,HD)

        ctx = jnp.concatenate(ctx_parts, axis=-1).reshape(BS, H)         # (BS, H)

        attn = jnp.dot(ctx.astype(jnp.bfloat16), wo_ref[l],
                       preferred_element_type=jnp.float32) + bo_ref[l]
        h1 = _layernorm(x + attn, ln1g_ref[l], ln1b_ref[l])

        ff = jnp.dot(h1.astype(jnp.bfloat16), w1_ref[l],
                     preferred_element_type=jnp.float32) + b1_ref[l]
        ff = _gelu_tanh(ff)
        ff = jnp.dot(ff.astype(jnp.bfloat16), w2_ref[l],
                     preferred_element_type=jnp.float32) + b2_ref[l]
        x = _layernorm(h1 + ff, ln2g_ref[l], ln2b_ref[l])

    # --- masked mean pooling (as a matmul) + L2 normalize (epilogue) ---
    pooled = jnp.dot(poolw_ref[...], x, preferred_element_type=jnp.float32)  # (B, H)
    ss = jnp.sum(pooled * pooled, axis=-1, keepdims=True)
    out_ref[...] = (pooled * jax.lax.rsqrt(jnp.maximum(ss, 1e-24))).astype(out_ref.dtype)


def fused_unixcoder_kernel(x_flat, negmask, poolw, p):
    # No grid: the whole (tiny) problem is one kernel invocation; every
    # operand is a whole-array VMEM block DMA'd exactly once.
    return pl.pallas_call(
        _fused_forward_kernel,
        out_shape=jax.ShapeDtypeStruct((B, H), jnp.float32),
    )(x_flat, negmask, poolw,
      p["emb_ln_g"], p["emb_ln_b"],
      p["wqkv"], p["bqkv"], p["wo"], p["bo"],
      p["ln1g"], p["ln1b"],
      p["w1"], p["b1"], p["w2"], p["b2"],
      p["ln2g"], p["ln2b"])


# ---------------------------------------------------------------------------
# Parameter init (deterministic), layer weights stacked along a leading L axis
# ---------------------------------------------------------------------------
def init_params(key):
    def nrm(k, shape):
        return (0.02 * jax.random.normal(k, shape)).astype(jnp.float32)

    keys = jax.random.split(key, 6)
    return {
        "word_emb": nrm(keys[0], (V, H)),
        "pos_emb": nrm(keys[1], (S, H)),
        "emb_ln_g": jnp.ones((1, H), jnp.float32),
        "emb_ln_b": jnp.zeros((1, H), jnp.float32),
        # matmul operands stored in bf16 (half the weight DMA bytes)
        "wqkv": nrm(keys[2], (L, H, 3 * H)).astype(jnp.bfloat16),
        "bqkv": jnp.zeros((L, 1, 3 * H), jnp.float32),
        "wo":   nrm(keys[3], (L, H, H)).astype(jnp.bfloat16),
        "bo":   jnp.zeros((L, 1, H), jnp.float32),
        "ln1g": jnp.ones((L, 1, H), jnp.float32),
        "ln1b": jnp.zeros((L, 1, H), jnp.float32),
        "w1":   nrm(keys[4], (L, H, FF)).astype(jnp.bfloat16),
        "b1":   jnp.zeros((L, 1, FF), jnp.float32),
        "w2":   nrm(keys[5], (L, FF, H)).astype(jnp.bfloat16),
        "b2":   jnp.zeros((L, 1, H), jnp.float32),
        "ln2g": jnp.ones((L, 1, H), jnp.float32),
        "ln2b": jnp.zeros((L, 1, H), jnp.float32),
    }


# ---------------------------------------------------------------------------
# Full forward (equivalent of UniXcoderModel.forward(code_inputs=input_ids))
# ---------------------------------------------------------------------------
@jax.jit
def unixcoder_forward(input_ids, params):
    mask = (input_ids != PAD_ID).astype(jnp.float32)                 # (B, S)

    # embedding gather is plain-JAX glue; everything downstream is one kernel
    x = params["word_emb"][input_ids] + params["pos_emb"][None, :, :]  # (B, S, H)
    x_flat = x.reshape(BS, H)

    # hoisted additive key mask (computed once, reused by every layer)
    negmask = ((1.0 - mask) * (-1e9)).reshape(B, 1, S)

    # masked mean pooling expressed as a (B, B*S) block-diagonal matmul
    # (mask / clamped count baked in; clamp avoids NaN for an all-PAD row)
    denom = jnp.maximum(jnp.sum(mask, axis=-1, keepdims=True), 1.0)  # (B, 1)
    mw = (mask / denom).reshape(BS)                                  # (BS,)
    row_owner = jnp.arange(BS) // S                                  # (BS,)
    poolw = jnp.where(row_owner[None, :] == jnp.arange(B)[:, None],
                      mw[None, :], 0.0).astype(jnp.float32)          # (B, BS)

    return fused_unixcoder_kernel(x_flat, negmask, poolw, params)


if __name__ == "__main__":
    key = jax.random.PRNGKey(0)
    pkey, dkey = jax.random.split(key)
    params = init_params(pkey)

    # Deterministic example ids; append PAD_ID tokens so the (ids != 1) mask
    # actually masks something, as in the PyTorch forward.
    ids = jax.random.randint(dkey, (B, S), minval=2, maxval=V, dtype=jnp.int32)
    ids = ids.at[0, S - 2:].set(PAD_ID)
    ids = ids.at[1, S - 3:].set(PAD_ID)

    out = jax.block_until_ready(unixcoder_forward(ids, params))

    assert out.shape == (B, H)
    norms = jnp.sqrt(jnp.sum(out * out, axis=-1))
    assert bool(jnp.all(jnp.isfinite(out)))
    assert bool(jnp.all(jnp.abs(norms - 1.0) < 1e-3))
    print("KERNEL_OK")
</pallas_src>

<mosaic_0001>
module attributes {stable_mosaic.version = 11 : i64} {
  func.func @_fused_forward_kernel(%arg0: memref<16x32xf32, #tpu.memory_space<vmem>>, %arg1: memref<2x1x8xf32, #tpu.memory_space<vmem>>, %arg2: memref<2x16xf32, #tpu.memory_space<vmem>>, %arg3: memref<1x32xf32, #tpu.memory_space<vmem>>, %arg4: memref<1x32xf32, #tpu.memory_space<vmem>>, %arg5: memref<2x32x96xbf16, #tpu.memory_space<vmem>>, %arg6: memref<2x1x96xf32, #tpu.memory_space<vmem>>, %arg7: memref<2x32x32xbf16, #tpu.memory_space<vmem>>, %arg8: memref<2x1x32xf32, #tpu.memory_space<vmem>>, %arg9: memref<2x1x32xf32, #tpu.memory_space<vmem>>, %arg10: memref<2x1x32xf32, #tpu.memory_space<vmem>>, %arg11: memref<2x32x64xbf16, #tpu.memory_space<vmem>>, %arg12: memref<2x1x64xf32, #tpu.memory_space<vmem>>, %arg13: memref<2x64x32xbf16, #tpu.memory_space<vmem>>, %arg14: memref<2x1x32xf32, #tpu.memory_space<vmem>>, %arg15: memref<2x1x32xf32, #tpu.memory_space<vmem>>, %arg16: memref<2x1x32xf32, #tpu.memory_space<vmem>>, %arg17: memref<2x32xf32, #tpu.memory_space<vmem>>) attributes {dimension_semantics = [], scalar_prefetch = 0 : i64, scratch_operands = 0 : i64, tpu.core_type = #tpu.core_type<tc>} {
    %c0 = arith.constant 0 : index
    %c0_0 = arith.constant 0 : index
    %c0_1 = arith.constant 0 : index
    %0 = vector.load %arg1[%c0, %c0_0, %c0_1] : memref<2x1x8xf32, #tpu.memory_space<vmem>>, vector<2x1x8xf32>
    %c0_2 = arith.constant 0 : index
    %c0_3 = arith.constant 0 : index
    %1 = vector.load %arg0[%c0_2, %c0_3] : memref<16x32xf32, #tpu.memory_space<vmem>>, vector<16x32xf32>
    %c0_4 = arith.constant 0 : index
    %c0_5 = arith.constant 0 : index
    %2 = vector.load %arg3[%c0_4, %c0_5] : memref<1x32xf32, #tpu.memory_space<vmem>>, vector<1x32xf32>
    %c0_6 = arith.constant 0 : index
    %c0_7 = arith.constant 0 : index
    %3 = vector.load %arg4[%c0_6, %c0_7] : memref<1x32xf32, #tpu.memory_space<vmem>>, vector<1x32xf32>
    %cst = arith.constant dense<0.000000e+00> : vector<16xf32>
    %4 = vector.multi_reduction <add>, %1, %cst [1] : vector<16x32xf32> to vector<16xf32>
    %5 = vector.shape_cast %4 : vector<16xf32> to vector<16x1xf32>
    %cst_8 = arith.constant 3.200000e+01 : f32
    %6 = vector.broadcast %cst_8 : f32 to vector<16x1xf32>
    %7 = arith.divf %5, %6 : vector<16x1xf32>
    %8 = vector.broadcast %7 : vector<16x1xf32> to vector<16x32xf32>
    %9 = arith.subf %1, %8 : vector<16x32xf32>
    %10 = arith.mulf %9, %9 : vector<16x32xf32>
    %cst_9 = arith.constant dense<0.000000e+00> : vector<16xf32>
    %11 = vector.multi_reduction <add>, %10, %cst_9 [1] : vector<16x32xf32> to vector<16xf32>
    %12 = vector.shape_cast %11 : vector<16xf32> to vector<16x1xf32>
    %cst_10 = arith.constant 3.200000e+01 : f32
    %13 = vector.broadcast %cst_10 : f32 to vector<16x1xf32>
    %14 = arith.divf %12, %13 : vector<16x1xf32>
    %cst_11 = arith.constant 9.99999996E-13 : f32
    %15 = vector.broadcast %cst_11 : f32 to vector<16x1xf32>
    %16 = arith.addf %14, %15 : vector<16x1xf32>
    %17 = math.rsqrt %16 : vector<16x1xf32>
    %18 = vector.broadcast %17 : vector<16x1xf32> to vector<16x32xf32>
    %19 = arith.mulf %9, %18 : vector<16x32xf32>
    %20 = vector.broadcast %2 : vector<1x32xf32> to vector<16x32xf32>
    %21 = arith.mulf %19, %20 : vector<16x32xf32>
    %22 = vector.broadcast %3 : vector<1x32xf32> to vector<16x32xf32>
    %23 = arith.addf %21, %22 : vector<16x32xf32>
    %24 = arith.truncf %23 : vector<16x32xf32> to vector<16x32xbf16>
    %c0_12 = arith.constant 0 : index
    %c0_13 = arith.constant 0 : index
    %c0_14 = arith.constant 0 : index
    %25 = vector.load %arg5[%c0_12, %c0_13, %c0_14] : memref<2x32x96xbf16, #tpu.memory_space<vmem>>, vector<1x32x96xbf16>
    %26 = vector.shape_cast %25 : vector<1x32x96xbf16> to vector<32x96xbf16>
    %cst_15 = arith.constant dense<0.000000e+00> : vector<16x96xf32>
    %27 = tpu.matmul %24, %26, %cst_15 {dimension_numbers = #tpu.dot_dimension_numbers<[1], [0], [0], [1], [0, 0, 1, 1], [], []>} : vector<16x32xbf16>, vector<32x96xbf16>, vector<16x96xf32> -> vector<16x96xf32>
    %c0_16 = arith.constant 0 : index
    %c0_17 = arith.constant 0 : index
    %c0_18 = arith.constant 0 : index
    %28 = vector.load %arg6[%c0_16, %c0_17, %c0_18] : memref<2x1x96xf32, #tpu.memory_space<vmem>>, vector<1x1x96xf32>
    %29 = vector.shape_cast %28 : vector<1x1x96xf32> to vector<1x96xf32>
    %30 = vector.broadcast %29 : vector<1x96xf32> to vector<16x96xf32>
    %31 = arith.addf %27, %30 : vector<16x96xf32>
    %32 = vector.shape_cast %31 : vector<16x96xf32> to vector<2x8x96xf32>
    %33 = vector.extract_strided_slice %32 {offsets = [0, 0, 0], sizes = [2, 8, 8], strides = [1, 1, 1]} : vector<2x8x96xf32> to vector<2x8x8xf32>
    %34 = vector.extract_strided_slice %32 {offsets = [0, 0, 32], sizes = [2, 8, 8], strides = [1, 1, 1]} : vector<2x8x96xf32> to vector<2x8x8xf32>
    %35 = vector.extract_strided_slice %32 {offsets = [0, 0, 64], sizes = [2, 8, 8], strides = [1, 1, 1]} : vector<2x8x96xf32> to vector<2x8x8xf32>
    %36 = arith.truncf %33 : vector<2x8x8xf32> to vector<2x8x8xbf16>
    %37 = arith.truncf %34 : vector<2x8x8xf32> to vector<2x8x8xbf16>
    "tpu.trace_start"() <{level = 10 : i32, message = "bqd,bkd->bqk"}> : () -> ()
    %cst_19 = arith.constant dense<0.000000e+00> : vector<2x8x8xf32>
    %38 = tpu.matmul %36, %37, %cst_19 {dimension_numbers = #tpu.dot_dimension_numbers<[2], [2], [1], [1], [0, 0, 0, 1, 1, 1], [0], [0]>} : vector<2x8x8xbf16>, vector<2x8x8xbf16>, vector<2x8x8xf32> -> vector<2x8x8xf32>
    "tpu.trace_stop"() : () -> ()
    %cst_20 = arith.constant 0.353553385 : f32
    %39 = vector.broadcast %cst_20 : f32 to vector<2x8x8xf32>
    %40 = arith.mulf %38, %39 : vector<2x8x8xf32>
    %41 = vector.broadcast %0 : vector<2x1x8xf32> to vector<2x8x8xf32>
    %42 = arith.addf %40, %41 : vector<2x8x8xf32>
    %cst_21 = arith.constant dense<0xFF800000> : vector<2x8xf32>
    %43 = vector.multi_reduction <maximumf>, %42, %cst_21 [2] : vector<2x8x8xf32> to vector<2x8xf32>
    %44 = vector.shape_cast %43 : vector<2x8xf32> to vector<2x8x1xf32>
    %45 = vector.broadcast %44 : vector<2x8x1xf32> to vector<2x8x8xf32>
    %46 = arith.subf %42, %45 : vector<2x8x8xf32>
    %47 = math.exp %46 : vector<2x8x8xf32>
    %cst_22 = arith.constant dense<0.000000e+00> : vector<2x8xf32>
    %48 = vector.multi_reduction <add>, %47, %cst_22 [2] : vector<2x8x8xf32> to vector<2x8xf32>
    %49 = vector.shape_cast %48 : vector<2x8xf32> to vector<2x8x1xf32>
    %50 = tpu.reciprocal %49 {approx = true} : vector<2x8x1xf32> -> vector<2x8x1xf32>
    %51 = vector.broadcast %50 : vector<2x8x1xf32> to vector<2x8x8xf32>
    %52 = arith.mulf %47, %51 : vector<2x8x8xf32>
    %53 = arith.truncf %52 : vector<2x8x8xf32> to vector<2x8x8xbf16>
    %54 = arith.truncf %35 : vector<2x8x8xf32> to vector<2x8x8xbf16>
    "tpu.trace_start"() <{level = 10 : i32, message = "bqk,bkd->bqd"}> : () -> ()
    %cst_23 = arith.constant dense<0.000000e+00> : vector<2x8x8xf32>
    %55 = tpu.matmul %53, %54, %cst_23 {dimension_numbers = #tpu.dot_dimension_numbers<[2], [1], [1], [2], [0, 0, 0, 1, 1, 2], [0], [0]>} : vector<2x8x8xbf16>, vector<2x8x8xbf16>, vector<2x8x8xf32> -> vector<2x8x8xf32>
    "tpu.trace_stop"() : () -> ()
    %56 = vector.extract_strided_slice %32 {offsets = [0, 0, 8], sizes = [2, 8, 8], strides = [1, 1, 1]} : vector<2x8x96xf32> to vector<2x8x8xf32>
    %57 = vector.extract_strided_slice %32 {offsets = [0, 0, 40], sizes = [2, 8, 8], strides = [1, 1, 1]} : vector<2x8x96xf32> to vector<2x8x8xf32>
    %58 = vector.extract_strided_slice %32 {offsets = [0, 0, 72], sizes = [2, 8, 8], strides = [1, 1, 1]} : vector<2x8x96xf32> to vector<2x8x8xf32>
    %59 = arith.truncf %56 : vector<2x8x8xf32> to vector<2x8x8xbf16>
    %60 = arith.truncf %57 : vector<2x8x8xf32> to vector<2x8x8xbf16>
    "tpu.trace_start"() <{level = 10 : i32, message = "bqd,bkd->bqk"}> : () -> ()
    %cst_24 = arith.constant dense<0.000000e+00> : vector<2x8x8xf32>
    %61 = tpu.matmul %59, %60, %cst_24 {dimension_numbers = #tpu.dot_dimension_numbers<[2], [2], [1], [1], [0, 0, 0, 1, 1, 1], [0], [0]>} : vector<2x8x8xbf16>, vector<2x8x8xbf16>, vector<2x8x8xf32> -> vector<2x8x8xf32>
    "tpu.trace_stop"() : () -> ()
    %cst_25 = arith.constant 0.353553385 : f32
    %62 = vector.broadcast %cst_25 : f32 to vector<2x8x8xf32>
    %63 = arith.mulf %61, %62 : vector<2x8x8xf32>
    %64 = vector.broadcast %0 : vector<2x1x8xf32> to vector<2x8x8xf32>
    %65 = arith.addf %63, %64 : vector<2x8x8xf32>
    %cst_26 = arith.constant dense<0xFF800000> : vector<2x8xf32>
    %66 = vector.multi_reduction <maximumf>, %65, %cst_26 [2] : vector<2x8x8xf32> to vector<2x8xf32>
    %67 = vector.shape_cast %66 : vector<2x8xf32> to vector<2x8x1xf32>
    %68 = vector.broadcast %67 : vector<2x8x1xf32> to vector<2x8x8xf32>
    %69 = arith.subf %65, %68 : vector<2x8x8xf32>
    %70 = math.exp %69 : vector<2x8x8xf32>
    %cst_27 = arith.constant dense<0.000000e+00> : vector<2x8xf32>
    %71 = vector.multi_reduction <add>, %70, %cst_27 [2] : vector<2x8x8xf32> to vector<2x8xf32>
    %72 = vector.shape_cast %71 : vector<2x8xf32> to vector<2x8x1xf32>
    %73 = tpu.reciprocal %72 {approx = true} : vector<2x8x1xf32> -> vector<2x8x1xf32>
    %74 = vector.broadcast %73 : vector<2x8x1xf32> to vector<2x8x8xf32>
    %75 = arith.mulf %70, %74 : vector<2x8x8xf32>
    %76 = arith.truncf %75 : vector<2x8x8xf32> to vector<2x8x8xbf16>
    %77 = arith.truncf %58 : vector<2x8x8xf32> to vector<2x8x8xbf16>
    "tpu.trace_start"() <{level = 10 : i32, message = "bqk,bkd->bqd"}> : () -> ()
    %cst_28 = arith.constant dense<0.000000e+00> : vector<2x8x8xf32>
    %78 = tpu.matmul %76, %77, %cst_28 {dimension_numbers = #tpu.dot_dimension_numbers<[2], [1], [1], [2], [0, 0, 0, 1, 1, 2], [0], [0]>} : vector<2x8x8xbf16>, vector<2x8x8xbf16>, vector<2x8x8xf32> -> vector<2x8x8xf32>
    "tpu.trace_stop"() : () -> ()
    %79 = vector.extract_strided_slice %32 {offsets = [0, 0, 16], sizes = [2, 8, 8], strides = [1, 1, 1]} : vector<2x8x96xf32> to vector<2x8x8xf32>
    %80 = vector.extract_strided_slice %32 {offsets = [0, 0, 48], sizes = [2, 8, 8], strides = [1, 1, 1]} : vector<2x8x96xf32> to vector<2x8x8xf32>
    %81 = vector.extract_strided_slice %32 {offsets = [0, 0, 80], sizes = [2, 8, 8], strides = [1, 1, 1]} : vector<2x8x96xf32> to vector<2x8x8xf32>
    %82 = arith.truncf %79 : vector<2x8x8xf32> to vector<2x8x8xbf16>
    %83 = arith.truncf %80 : vector<2x8x8xf32> to vector<2x8x8xbf16>
    "tpu.trace_start"() <{level = 10 : i32, message = "bqd,bkd->bqk"}> : () -> ()
    %cst_29 = arith.constant dense<0.000000e+00> : vector<2x8x8xf32>
    %84 = tpu.matmul %82, %83, %cst_29 {dimension_numbers = #tpu.dot_dimension_numbers<[2], [2], [1], [1], [0, 0, 0, 1, 1, 1], [0], [0]>} : vector<2x8x8xbf16>, vector<2x8x8xbf16>, vector<2x8x8xf32> -> vector<2x8x8xf32>
    "tpu.trace_stop"() : () -> ()
    %cst_30 = arith.constant 0.353553385 : f32
    %85 = vector.broadcast %cst_30 : f32 to vector<2x8x8xf32>
    %86 = arith.mulf %84, %85 : vector<2x8x8xf32>
    %87 = vector.broadcast %0 : vector<2x1x8xf32> to vector<2x8x8xf32>
    %88 = arith.addf %86, %87 : vector<2x8x8xf32>
    %cst_31 = arith.constant dense<0xFF800000> : vector<2x8xf32>
    %89 = vector.multi_reduction <maximumf>, %88, %cst_31 [2] : vector<2x8x8xf32> to vector<2x8xf32>
    %90 = vector.shape_cast %89 : vector<2x8xf32> to vector<2x8x1xf32>
    %91 = vector.broadcast %90 : vector<2x8x1xf32> to vector<2x8x8xf32>
    %92 = arith.subf %88, %91 : vector<2x8x8xf32>
    %93 = math.exp %92 : vector<2x8x8xf32>
    %cst_32 = arith.constant dense<0.000000e+00> : vector<2x8xf32>
    %94 = vector.multi_reduction <add>, %93, %cst_32 [2] : vector<2x8x8xf32> to vector<2x8xf32>
    %95 = vector.shape_cast %94 : vector<2x8xf32> to vector<2x8x1xf32>
    %96 = tpu.reciprocal %95 {approx = true} : vector<2x8x1xf32> -> vector<2x8x1xf32>
    %97 = vector.broadcast %96 : vector<2x8x1xf32> to vector<2x8x8xf32>
    %98 = arith.mulf %93, %97 : vector<2x8x8xf32>
    %99 = arith.truncf %98 : vector<2x8x8xf32> to vector<2x8x8xbf16>
    %100 = arith.truncf %81 : vector<2x8x8xf32> to vector<2x8x8xbf16>
    "tpu.trace_start"() <{level = 10 : i32, message = "bqk,bkd->bqd"}> : () -> ()
    %cst_33 = arith.constant dense<0.000000e+00> : vector<2x8x8xf32>
    %101 = tpu.matmul %99, %100, %cst_33 {dimension_numbers = #tpu.dot_dimension_numbers<[2], [1], [1], [2], [0, 0, 0, 1, 1, 2], [0], [0]>} : vector<2x8x8xbf16>, vector<2x8x8xbf16>, vector<2x8x8xf32> -> vector<2x8x8xf32>
    "tpu.trace_stop"() : () -> ()
    %102 = vector.extract_strided_slice %32 {offsets = [0, 0, 24], sizes = [2, 8, 8], strides = [1, 1, 1]} : vector<2x8x96xf32> to vector<2x8x8xf32>
    %103 = vector.extract_strided_slice %32 {offsets = [0, 0, 56], sizes = [2, 8, 8], strides = [1, 1, 1]} : vector<2x8x96xf32> to vector<2x8x8xf32>
    %104 = vector.extract_strided_slice %32 {offsets = [0, 0, 88], sizes = [2, 8, 8], strides = [1, 1, 1]} : vector<2x8x96xf32> to vector<2x8x8xf32>
    %105 = arith.truncf %102 : vector<2x8x8xf32> to vector<2x8x8xbf16>
    %106 = arith.truncf %103 : vector<2x8x8xf32> to vector<2x8x8xbf16>
    "tpu.trace_start"() <{level = 10 : i32, message = "bqd,bkd->bqk"}> : () -> ()
    %cst_34 = arith.constant dense<0.000000e+00> : vector<2x8x8xf32>
    %107 = tpu.matmul %105, %106, %cst_34 {dimension_numbers = #tpu.dot_dimension_numbers<[2], [2], [1], [1], [0, 0, 0, 1, 1, 1], [0], [0]>} : vector<2x8x8xbf16>, vector<2x8x8xbf16>, vector<2x8x8xf32> -> vector<2x8x8xf32>
    "tpu.trace_stop"() : () -> ()
    %cst_35 = arith.constant 0.353553385 : f32
    %108 = vector.broadcast %cst_35 : f32 to vector<2x8x8xf32>
    %109 = arith.mulf %107, %108 : vector<2x8x8xf32>
    %110 = vector.broadcast %0 : vector<2x1x8xf32> to vector<2x8x8xf32>
    %111 = arith.addf %109, %110 : vector<2x8x8xf32>
    %cst_36 = arith.constant dense<0xFF800000> : vector<2x8xf32>
    %112 = vector.multi_reduction <maximumf>, %111, %cst_36 [2] : vector<2x8x8xf32> to vector<2x8xf32>
    %113 = vector.shape_cast %112 : vector<2x8xf32> to vector<2x8x1xf32>
    %114 = vector.broadcast %113 : vector<2x8x1xf32> to vector<2x8x8xf32>
    %115 = arith.subf %111, %114 : vector<2x8x8xf32>
    %116 = math.exp %115 : vector<2x8x8xf32>
    %cst_37 = arith.constant dense<0.000000e+00> : vector<2x8xf32>
    %117 = vector.multi_reduction <add>, %116, %cst_37 [2] : vector<2x8x8xf32> to vector<2x8xf32>
    %118 = vector.shape_cast %117 : vector<2x8xf32> to vector<2x8x1xf32>
    %119 = tpu.reciprocal %118 {approx = true} : vector<2x8x1xf32> -> vector<2x8x1xf32>
    %120 = vector.broadcast %119 : vector<2x8x1xf32> to vector<2x8x8xf32>
    %121 = arith.mulf %116, %120 : vector<2x8x8xf32>
    %122 = arith.truncf %121 : vector<2x8x8xf32> to vector<2x8x8xbf16>
    %123 = arith.truncf %104 : vector<2x8x8xf32> to vector<2x8x8xbf16>
    "tpu.trace_start"() <{level = 10 : i32, message = "bqk,bkd->bqd"}> : () -> ()
    %cst_38 = arith.constant dense<0.000000e+00> : vector<2x8x8xf32>
    %124 = tpu.matmul %122, %123, %cst_38 {dimension_numbers = #tpu.dot_dimension_numbers<[2], [1], [1], [2], [0, 0, 0, 1, 1, 2], [0], [0]>} : vector<2x8x8xbf16>, vector<2x8x8xbf16>, vector<2x8x8xf32> -> vector<2x8x8xf32>
    "tpu.trace_stop"() : () -> ()
    %125 = tpu.concatenate %55, %78, %101, %124 in 2 : vector<2x8x8xf32>, vector<2x8x8xf32>, vector<2x8x8xf32>, vector<2x8x8xf32> -> vector<2x8x32xf32>
    %126 = vector.shape_cast %125 : vector<2x8x32xf32> to vector<16x32xf32>
    %127 = arith.truncf %126 : vector<16x32xf32> to vector<16x32xbf16>
    %c0_39 = arith.constant 0 : index
    %c0_40 = arith.constant 0 : index
    %c0_41 = arith.constant 0 : index
    %128 = vector.load %arg7[%c0_39, %c0_40, %c0_41] : memref<2x32x32xbf16, #tpu.memory_space<vmem>>, vector<1x32x32xbf16>
    %129 = vector.shape_cast %128 : vector<1x32x32xbf16> to vector<32x32xbf16>
    %cst_42 = arith.constant dense<0.000000e+00> : vector<16x32xf32>
    %130 = tpu.matmul %127, %129, %cst_42 {dimension_numbers = #tpu.dot_dimension_numbers<[1], [0], [0], [1], [0, 0, 1, 1], [], []>} : vector<16x32xbf16>, vector<32x32xbf16>, vector<16x32xf32> -> vector<16x32xf32>
    %c0_43 = arith.constant 0 : index
    %c0_44 = arith.constant 0 : index
    %c0_45 = arith.constant 0 : index
    %131 = vector.load %arg8[%c0_43, %c0_44, %c0_45] : memref<2x1x32xf32, #tpu.memory_space<vmem>>, vector<1x1x32xf32>
    %132 = vector.shape_cast %131 : vector<1x1x32xf32> to vector<1x32xf32>
    %133 = vector.broadcast %132 : vector<1x32xf32> to vector<16x32xf32>
    %134 = arith.addf %130, %133 : vector<16x32xf32>
    %135 = arith.addf %23, %134 : vector<16x32xf32>
    %c0_46 = arith.constant 0 : index
    %c0_47 = arith.constant 0 : index
    %c0_48 = arith.constant 0 : index
    %136 = vector.load %arg9[%c0_46, %c0_47, %c0_48] : memref<2x1x32xf32, #tpu.memory_space<vmem>>, vector<1x1x32xf32>
    %137 = vector.shape_cast %136 : vector<1x1x32xf32> to vector<1x32xf32>
    %c0_49 = arith.constant 0 : index
    %c0_50 = arith.constant 0 : index
    %c0_51 = arith.constant 0 : index
    %138 = vector.load %arg10[%c0_49, %c0_50, %c0_51] : memref<2x1x32xf32, #tpu.memory_space<vmem>>, vector<1x1x32xf32>
    %139 = vector.shape_cast %138 : vector<1x1x32xf32> to vector<1x32xf32>
    %cst_52 = arith.constant dense<0.000000e+00> : vector<16xf32>
    %140 = vector.multi_reduction <add>, %135, %cst_52 [1] : vector<16x32xf32> to vector<16xf32>
    %141 = vector.shape_cast %140 : vector<16xf32> to vector<16x1xf32>
    %cst_53 = arith.constant 3.200000e+01 : f32
    %142 = vector.broadcast %cst_53 : f32 to vector<16x1xf32>
    %143 = arith.divf %141, %142 : vector<16x1xf32>
    %144 = vector.broadcast %143 : vector<16x1xf32> to vector<16x32xf32>
    %145 = arith.subf %135, %144 : vector<16x32xf32>
    %146 = arith.mulf %145, %145 : vector<16x32xf32>
    %cst_54 = arith.constant dense<0.000000e+00> : vector<16xf32>
    %147 = vector.multi_reduction <add>, %146, %cst_54 [1] : vector<16x32xf32> to vector<16xf32>
    %148 = vector.shape_cast %147 : vector<16xf32> to vector<16x1xf32>
    %cst_55 = arith.constant 3.200000e+01 : f32
    %149 = vector.broadcast %cst_55 : f32 to vector<16x1xf32>
    %150 = arith.divf %148, %149 : vector<16x1xf32>
    %cst_56 = arith.constant 9.99999996E-13 : f32
    %151 = vector.broadcast %cst_56 : f32 to vector<16x1xf32>
    %152 = arith.addf %150, %151 : vector<16x1xf32>
    %153 = math.rsqrt %152 : vector<16x1xf32>
    %154 = vector.broadcast %153 : vector<16x1xf32> to vector<16x32xf32>
    %155 = arith.mulf %145, %154 : vector<16x32xf32>
    %156 = vector.broadcast %137 : vector<1x32xf32> to vector<16x32xf32>
    %157 = arith.mulf %155, %156 : vector<16x32xf32>
    %158 = vector.broadcast %139 : vector<1x32xf32> to vector<16x32xf32>
    %159 = arith.addf %157, %158 : vector<16x32xf32>
    %160 = arith.truncf %159 : vector<16x32xf32> to vector<16x32xbf16>
    %c0_57 = arith.constant 0 : index
    %c0_58 = arith.constant 0 : index
    %c0_59 = arith.constant 0 : index
    %161 = vector.load %arg11[%c0_57, %c0_58, %c0_59] : memref<2x32x64xbf16, #tpu.memory_space<vmem>>, vector<1x32x64xbf16>
    %162 = vector.shape_cast %161 : vector<1x32x64xbf16> to vector<32x64xbf16>
    %cst_60 = arith.constant dense<0.000000e+00> : vector<16x64xf32>
    %163 = tpu.matmul %160, %162, %cst_60 {dimension_numbers = #tpu.dot_dimension_numbers<[1], [0], [0], [1], [0, 0, 1, 1], [], []>} : vector<16x32xbf16>, vector<32x64xbf16>, vector<16x64xf32> -> vector<16x64xf32>
    %c0_61 = arith.constant 0 : index
    %c0_62 = arith.constant 0 : index
    %c0_63 = arith.constant 0 : index
    %164 = vector.load %arg12[%c0_61, %c0_62, %c0_63] : memref<2x1x64xf32, #tpu.memory_space<vmem>>, vector<1x1x64xf32>
    %165 = vector.shape_cast %164 : vector<1x1x64xf32> to vector<1x64xf32>
    %166 = vector.broadcast %165 : vector<1x64xf32> to vector<16x64xf32>
    %167 = arith.addf %163, %166 : vector<16x64xf32>
    %cst_64 = arith.constant 5.000000e-01 : f32
    %168 = vector.broadcast %cst_64 : f32 to vector<16x64xf32>
    %169 = arith.mulf %168, %167 : vector<16x64xf32>
    %cst_65 = arith.constant 4.471500e-02 : f32
    %170 = vector.broadcast %cst_65 : f32 to vector<16x64xf32>
    %171 = arith.mulf %170, %167 : vector<16x64xf32>
    %172 = arith.mulf %171, %167 : vector<16x64xf32>
    %173 = arith.mulf %172, %167 : vector<16x64xf32>
    %174 = arith.addf %167, %173 : vector<16x64xf32>
    %cst_66 = arith.constant 0.797884583 : f32
    %175 = vector.broadcast %cst_66 : f32 to vector<16x64xf32>
    %176 = arith.mulf %175, %174 : vector<16x64xf32>
    %177 = math.tanh %176 : vector<16x64xf32>
    %cst_67 = arith.constant 1.000000e+00 : f32
    %178 = vector.broadcast %cst_67 : f32 to vector<16x64xf32>
    %179 = arith.addf %178, %177 : vector<16x64xf32>
    %180 = arith.mulf %169, %179 : vector<16x64xf32>
    %181 = arith.truncf %180 : vector<16x64xf32> to vector<16x64xbf16>
    %c0_68 = arith.constant 0 : index
    %c0_69 = arith.constant 0 : index
    %c0_70 = arith.constant 0 : index
    %182 = vector.load %arg13[%c0_68, %c0_69, %c0_70] : memref<2x64x32xbf16, #tpu.memory_space<vmem>>, vector<1x64x32xbf16>
    %183 = vector.shape_cast %182 : vector<1x64x32xbf16> to vector<64x32xbf16>
    %cst_71 = arith.constant dense<0.000000e+00> : vector<16x32xf32>
    %184 = tpu.matmul %181, %183, %cst_71 {dimension_numbers = #tpu.dot_dimension_numbers<[1], [0], [0], [1], [0, 0, 1, 1], [], []>} : vector<16x64xbf16>, vector<64x32xbf16>, vector<16x32xf32> -> vector<16x32xf32>
    %c0_72 = arith.constant 0 : index
    %c0_73 = arith.constant 0 : index
    %c0_74 = arith.constant 0 : index
    %185 = vector.load %arg14[%c0_72, %c0_73, %c0_74] : memref<2x1x32xf32, #tpu.memory_space<vmem>>, vector<1x1x32xf32>
    %186 = vector.shape_cast %185 : vector<1x1x32xf32> to vector<1x32xf32>
    %187 = vector.broadcast %186 : vector<1x32xf32> to vector<16x32xf32>
    %188 = arith.addf %184, %187 : vector<16x32xf32>
    %189 = arith.addf %159, %188 : vector<16x32xf32>
    %c0_75 = arith.constant 0 : index
    %c0_76 = arith.constant 0 : index
    %c0_77 = arith.constant 0 : index
    %190 = vector.load %arg15[%c0_75, %c0_76, %c0_77] : memref<2x1x32xf32, #tpu.memory_space<vmem>>, vector<1x1x32xf32>
    %191 = vector.shape_cast %190 : vector<1x1x32xf32> to vector<1x32xf32>
    %c0_78 = arith.constant 0 : index
    %c0_79 = arith.constant 0 : index
    %c0_80 = arith.constant 0 : index
    %192 = vector.load %arg16[%c0_78, %c0_79, %c0_80] : memref<2x1x32xf32, #tpu.memory_space<vmem>>, vector<1x1x32xf32>
    %193 = vector.shape_cast %192 : vector<1x1x32xf32> to vector<1x32xf32>
    %cst_81 = arith.constant dense<0.000000e+00> : vector<16xf32>
    %194 = vector.multi_reduction <add>, %189, %cst_81 [1] : vector<16x32xf32> to vector<16xf32>
    %195 = vector.shape_cast %194 : vector<16xf32> to vector<16x1xf32>
    %cst_82 = arith.constant 3.200000e+01 : f32
    %196 = vector.broadcast %cst_82 : f32 to vector<16x1xf32>
    %197 = arith.divf %195, %196 : vector<16x1xf32>
    %198 = vector.broadcast %197 : vector<16x1xf32> to vector<16x32xf32>
    %199 = arith.subf %189, %198 : vector<16x32xf32>
    %200 = arith.mulf %199, %199 : vector<16x32xf32>
    %cst_83 = arith.constant dense<0.000000e+00> : vector<16xf32>
    %201 = vector.multi_reduction <add>, %200, %cst_83 [1] : vector<16x32xf32> to vector<16xf32>
    %202 = vector.shape_cast %201 : vector<16xf32> to vector<16x1xf32>
    %cst_84 = arith.constant 3.200000e+01 : f32
    %203 = vector.broadcast %cst_84 : f32 to vector<16x1xf32>
    %204 = arith.divf %202, %203 : vector<16x1xf32>
    %cst_85 = arith.constant 9.99999996E-13 : f32
    %205 = vector.broadcast %cst_85 : f32 to vector<16x1xf32>
    %206 = arith.addf %204, %205 : vector<16x1xf32>
    %207 = math.rsqrt %206 : vector<16x1xf32>
    %208 = vector.broadcast %207 : vector<16x1xf32> to vector<16x32xf32>
    %209 = arith.mulf %199, %208 : vector<16x32xf32>
    %210 = vector.broadcast %191 : vector<1x32xf32> to vector<16x32xf32>
    %211 = arith.mulf %209, %210 : vector<16x32xf32>
    %212 = vector.broadcast %193 : vector<1x32xf32> to vector<16x32xf32>
    %213 = arith.addf %211, %212 : vector<16x32xf32>
    %214 = arith.truncf %213 : vector<16x32xf32> to vector<16x32xbf16>
    %c1 = arith.constant 1 : index
    %c0_86 = arith.constant 0 : index
    %c0_87 = arith.constant 0 : index
    %215 = vector.load %arg5[%c1, %c0_86, %c0_87] : memref<2x32x96xbf16, #tpu.memory_space<vmem>>, vector<1x32x96xbf16>
    %216 = vector.shape_cast %215 : vector<1x32x96xbf16> to vector<32x96xbf16>
    %cst_88 = arith.constant dense<0.000000e+00> : vector<16x96xf32>
    %217 = tpu.matmul %214, %216, %cst_88 {dimension_numbers = #tpu.dot_dimension_numbers<[1], [0], [0], [1], [0, 0, 1, 1], [], []>} : vector<16x32xbf16>, vector<32x96xbf16>, vector<16x96xf32> -> vector<16x96xf32>
    %c1_89 = arith.constant 1 : index
    %c0_90 = arith.constant 0 : index
    %c0_91 = arith.constant 0 : index
    %218 = vector.load %arg6[%c1_89, %c0_90, %c0_91] : memref<2x1x96xf32, #tpu.memory_space<vmem>>, vector<1x1x96xf32>
    %219 = vector.shape_cast %218 : vector<1x1x96xf32> to vector<1x96xf32>
    %220 = vector.broadcast %219 : vector<1x96xf32> to vector<16x96xf32>
    %221 = arith.addf %217, %220 : vector<16x96xf32>
    %222 = vector.shape_cast %221 : vector<16x96xf32> to vector<2x8x96xf32>
    %223 = vector.extract_strided_slice %222 {offsets = [0, 0, 0], sizes = [2, 8, 8], strides = [1, 1, 1]} : vector<2x8x96xf32> to vector<2x8x8xf32>
    %224 = vector.extract_strided_slice %222 {offsets = [0, 0, 32], sizes = [2, 8, 8], strides = [1, 1, 1]} : vector<2x8x96xf32> to vector<2x8x8xf32>
    %225 = vector.extract_strided_slice %222 {offsets = [0, 0, 64], sizes = [2, 8, 8], strides = [1, 1, 1]} : vector<2x8x96xf32> to vector<2x8x8xf32>
    %226 = arith.truncf %223 : vector<2x8x8xf32> to vector<2x8x8xbf16>
    %227 = arith.truncf %224 : vector<2x8x8xf32> to vector<2x8x8xbf16>
    "tpu.trace_start"() <{level = 10 : i32, message = "bqd,bkd->bqk"}> : () -> ()
    %cst_92 = arith.constant dense<0.000000e+00> : vector<2x8x8xf32>
    %228 = tpu.matmul %226, %227, %cst_92 {dimension_numbers = #tpu.dot_dimension_numbers<[2], [2], [1], [1], [0, 0, 0, 1, 1, 1], [0], [0]>} : vector<2x8x8xbf16>, vector<2x8x8xbf16>, vector<2x8x8xf32> -> vector<2x8x8xf32>
    "tpu.trace_stop"() : () -> ()
    %cst_93 = arith.constant 0.353553385 : f32
    %229 = vector.broadcast %cst_93 : f32 to vector<2x8x8xf32>
    %230 = arith.mulf %228, %229 : vector<2x8x8xf32>
    %231 = vector.broadcast %0 : vector<2x1x8xf32> to vector<2x8x8xf32>
    %232 = arith.addf %230, %231 : vector<2x8x8xf32>
    %cst_94 = arith.constant dense<0xFF800000> : vector<2x8xf32>
    %233 = vector.multi_reduction <maximumf>, %232, %cst_94 [2] : vector<2x8x8xf32> to vector<2x8xf32>
    %234 = vector.shape_cast %233 : vector<2x8xf32> to vector<2x8x1xf32>
    %235 = vector.broadcast %234 : vector<2x8x1xf32> to vector<2x8x8xf32>
    %236 = arith.subf %232, %235 : vector<2x8x8xf32>
    %237 = math.exp %236 : vector<2x8x8xf32>
    %cst_95 = arith.constant dense<0.000000e+00> : vector<2x8xf32>
    %238 = vector.multi_reduction <add>, %237, %cst_95 [2] : vector<2x8x8xf32> to vector<2x8xf32>
    %239 = vector.shape_cast %238 : vector<2x8xf32> to vector<2x8x1xf32>
    %240 = tpu.reciprocal %239 {approx = true} : vector<2x8x1xf32> -> vector<2x8x1xf32>
    %241 = vector.broadcast %240 : vector<2x8x1xf32> to vector<2x8x8xf32>
    %242 = arith.mulf %237, %241 : vector<2x8x8xf32>
    %243 = arith.truncf %242 : vector<2x8x8xf32> to vector<2x8x8xbf16>
    %244 = arith.truncf %225 : vector<2x8x8xf32> to vector<2x8x8xbf16>
    "tpu.trace_start"() <{level = 10 : i32, message = "bqk,bkd->bqd"}> : () -> ()
    %cst_96 = arith.constant dense<0.000000e+00> : vector<2x8x8xf32>
    %245 = tpu.matmul %243, %244, %cst_96 {dimension_numbers = #tpu.dot_dimension_numbers<[2], [1], [1], [2], [0, 0, 0, 1, 1, 2], [0], [0]>} : vector<2x8x8xbf16>, vector<2x8x8xbf16>, vector<2x8x8xf32> -> vector<2x8x8xf32>
    "tpu.trace_stop"() : () -> ()
    %246 = vector.extract_strided_slice %222 {offsets = [0, 0, 8], sizes = [2, 8, 8], strides = [1, 1, 1]} : vector<2x8x96xf32> to vector<2x8x8xf32>
    %247 = vector.extract_strided_slice %222 {offsets = [0, 0, 40], sizes = [2, 8, 8], strides = [1, 1, 1]} : vector<2x8x96xf32> to vector<2x8x8xf32>
    %248 = vector.extract_strided_slice %222 {offsets = [0, 0, 72], sizes = [2, 8, 8], strides = [1, 1, 1]} : vector<2x8x96xf32> to vector<2x8x8xf32>
    %249 = arith.truncf %246 : vector<2x8x8xf32> to vector<2x8x8xbf16>
    %250 = arith.truncf %247 : vector<2x8x8xf32> to vector<2x8x8xbf16>
    "tpu.trace_start"() <{level = 10 : i32, message = "bqd,bkd->bqk"}> : () -> ()
    %cst_97 = arith.constant dense<0.000000e+00> : vector<2x8x8xf32>
    %251 = tpu.matmul %249, %250, %cst_97 {dimension_numbers = #tpu.dot_dimension_numbers<[2], [2], [1], [1], [0, 0, 0, 1, 1, 1], [0], [0]>} : vector<2x8x8xbf16>, vector<2x8x8xbf16>, vector<2x8x8xf32> -> vector<2x8x8xf32>
    "tpu.trace_stop"() : () -> ()
    %cst_98 = arith.constant 0.353553385 : f32
    %252 = vector.broadcast %cst_98 : f32 to vector<2x8x8xf32>
    %253 = arith.mulf %251, %252 : vector<2x8x8xf32>
    %254 = vector.broadcast %0 : vector<2x1x8xf32> to vector<2x8x8xf32>
    %255 = arith.addf %253, %254 : vector<2x8x8xf32>
    %cst_99 = arith.constant dense<0xFF800000> : vector<2x8xf32>
    %256 = vector.multi_reduction <maximumf>, %255, %cst_99 [2] : vector<2x8x8xf32> to vector<2x8xf32>
    %257 = vector.shape_cast %256 : vector<2x8xf32> to vector<2x8x1xf32>
    %258 = vector.broadcast %257 : vector<2x8x1xf32> to vector<2x8x8xf32>
    %259 = arith.subf %255, %258 : vector<2x8x8xf32>
    %260 = math.exp %259 : vector<2x8x8xf32>
    %cst_100 = arith.constant dense<0.000000e+00> : vector<2x8xf32>
    %261 = vector.multi_reduction <add>, %260, %cst_100 [2] : vector<2x8x8xf32> to vector<2x8xf32>
    %262 = vector.shape_cast %261 : vector<2x8xf32> to vector<2x8x1xf32>
    %263 = tpu.reciprocal %262 {approx = true} : vector<2x8x1xf32> -> vector<2x8x1xf32>
    %264 = vector.broadcast %263 : vector<2x8x1xf32> to vector<2x8x8xf32>
    %265 = arith.mulf %260, %264 : vector<2x8x8xf32>
    %266 = arith.truncf %265 : vector<2x8x8xf32> to vector<2x8x8xbf16>
    %267 = arith.truncf %248 : vector<2x8x8xf32> to vector<2x8x8xbf16>
    "tpu.trace_start"() <{level = 10 : i32, message = "bqk,bkd->bqd"}> : () -> ()
    %cst_101 = arith.constant dense<0.000000e+00> : vector<2x8x8xf32>
    %268 = tpu.matmul %266, %267, %cst_101 {dimension_numbers = #tpu.dot_dimension_numbers<[2], [1], [1], [2], [0, 0, 0, 1, 1, 2], [0], [0]>} : vector<2x8x8xbf16>, vector<2x8x8xbf16>, vector<2x8x8xf32> -> vector<2x8x8xf32>
    "tpu.trace_stop"() : () -> ()
    %269 = vector.extract_strided_slice %222 {offsets = [0, 0, 16], sizes = [2, 8, 8], strides = [1, 1, 1]} : vector<2x8x96xf32> to vector<2x8x8xf32>
    %270 = vector.extract_strided_slice %222 {offsets = [0, 0, 48], sizes = [2, 8, 8], strides = [1, 1, 1]} : vector<2x8x96xf32> to vector<2x8x8xf32>
    %271 = vector.extract_strided_slice %222 {offsets = [0, 0, 80], sizes = [2, 8, 8], strides = [1, 1, 1]} : vector<2x8x96xf32> to vector<2x8x8xf32>
    %272 = arith.truncf %269 : vector<2x8x8xf32> to vector<2x8x8xbf16>
    %273 = arith.truncf %270 : vector<2x8x8xf32> to vector<2x8x8xbf16>
    "tpu.trace_start"() <{level = 10 : i32, message = "bqd,bkd->bqk"}> : () -> ()
    %cst_102 = arith.constant dense<0.000000e+00> : vector<2x8x8xf32>
    %274 = tpu.matmul %272, %273, %cst_102 {dimension_numbers = #tpu.dot_dimension_numbers<[2], [2], [1], [1], [0, 0, 0, 1, 1, 1], [0], [0]>} : vector<2x8x8xbf16>, vector<2x8x8xbf16>, vector<2x8x8xf32> -> vector<2x8x8xf32>
    "tpu.trace_stop"() : () -> ()
    %cst_103 = arith.constant 0.353553385 : f32
    %275 = vector.broadcast %cst_103 : f32 to vector<2x8x8xf32>
    %276 = arith.mulf %274, %275 : vector<2x8x8xf32>
    %277 = vector.broadcast %0 : vector<2x1x8xf32> to vector<2x8x8xf32>
    %278 = arith.addf %276, %277 : vector<2x8x8xf32>
    %cst_104 = arith.constant dense<0xFF800000> : vector<2x8xf32>
    %279 = vector.multi_reduction <maximumf>, %278, %cst_104 [2] : vector<2x8x8xf32> to vector<2x8xf32>
    %280 = vector.shape_cast %279 : vector<2x8xf32> to vector<2x8x1xf32>
    %281 = vector.broadcast %280 : vector<2x8x1xf32> to vector<2x8x8xf32>
    %282 = arith.subf %278, %281 : vector<2x8x8xf32>
    %283 = math.exp %282 : vector<2x8x8xf32>
    %cst_105 = arith.constant dense<0.000000e+00> : vector<2x8xf32>
    %284 = vector.multi_reduction <add>, %283, %cst_105 [2] : vector<2x8x8xf32> to vector<2x8xf32>
    %285 = vector.shape_cast %284 : vector<2x8xf32> to vector<2x8x1xf32>
    %286 = tpu.reciprocal %285 {approx = true} : vector<2x8x1xf32> -> vector<2x8x1xf32>
    %287 = vector.broadcast %286 : vector<2x8x1xf32> to vector<2x8x8xf32>
    %288 = arith.mulf %283, %287 : vector<2x8x8xf32>
    %289 = arith.truncf %288 : vector<2x8x8xf32> to vector<2x8x8xbf16>
    %290 = arith.truncf %271 : vector<2x8x8xf32> to vector<2x8x8xbf16>
    "tpu.trace_start"() <{level = 10 : i32, message = "bqk,bkd->bqd"}> : () -> ()
    %cst_106 = arith.constant dense<0.000000e+00> : vector<2x8x8xf32>
    %291 = tpu.matmul %289, %290, %cst_106 {dimension_numbers = #tpu.dot_dimension_numbers<[2], [1], [1], [2], [0, 0, 0, 1, 1, 2], [0], [0]>} : vector<2x8x8xbf16>, vector<2x8x8xbf16>, vector<2x8x8xf32> -> vector<2x8x8xf32>
    "tpu.trace_stop"() : () -> ()
    %292 = vector.extract_strided_slice %222 {offsets = [0, 0, 24], sizes = [2, 8, 8], strides = [1, 1, 1]} : vector<2x8x96xf32> to vector<2x8x8xf32>
    %293 = vector.extract_strided_slice %222 {offsets = [0, 0, 56], sizes = [2, 8, 8], strides = [1, 1, 1]} : vector<2x8x96xf32> to vector<2x8x8xf32>
    %294 = vector.extract_strided_slice %222 {offsets = [0, 0, 88], sizes = [2, 8, 8], strides = [1, 1, 1]} : vector<2x8x96xf32> to vector<2x8x8xf32>
    %295 = arith.truncf %292 : vector<2x8x8xf32> to vector<2x8x8xbf16>
    %296 = arith.truncf %293 : vector<2x8x8xf32> to vector<2x8x8xbf16>
    "tpu.trace_start"() <{level = 10 : i32, message = "bqd,bkd->bqk"}> : () -> ()
    %cst_107 = arith.constant dense<0.000000e+00> : vector<2x8x8xf32>
    %297 = tpu.matmul %295, %296, %cst_107 {dimension_numbers = #tpu.dot_dimension_numbers<[2], [2], [1], [1], [0, 0, 0, 1, 1, 1], [0], [0]>} : vector<2x8x8xbf16>, vector<2x8x8xbf16>, vector<2x8x8xf32> -> vector<2x8x8xf32>
    "tpu.trace_stop"() : () -> ()
    %cst_108 = arith.constant 0.353553385 : f32
    %298 = vector.broadcast %cst_108 : f32 to vector<2x8x8xf32>
    %299 = arith.mulf %297, %298 : vector<2x8x8xf32>
    %300 = vector.broadcast %0 : vector<2x1x8xf32> to vector<2x8x8xf32>
    %301 = arith.addf %299, %300 : vector<2x8x8xf32>
    %cst_109 = arith.constant dense<0xFF800000> : vector<2x8xf32>
    %302 = vector.multi_reduction <maximumf>, %301, %cst_109 [2] : vector<2x8x8xf32> to vector<2x8xf32>
    %303 = vector.shape_cast %302 : vector<2x8xf32> to vector<2x8x1xf32>
    %304 = vector.broadcast %303 : vector<2x8x1xf32> to vector<2x8x8xf32>
    %305 = arith.subf %301, %304 : vector<2x8x8xf32>
    %306 = math.exp %305 : vector<2x8x8xf32>
    %cst_110 = arith.constant dense<0.000000e+00> : vector<2x8xf32>
    %307 = vector.multi_reduction <add>, %306, %cst_110 [2] : vector<2x8x8xf32> to vector<2x8xf32>
    %308 = vector.shape_cast %307 : vector<2x8xf32> to vector<2x8x1xf32>
    %309 = tpu.reciprocal %308 {approx = true} : vector<2x8x1xf32> -> vector<2x8x1xf32>
    %310 = vector.broadcast %309 : vector<2x8x1xf32> to vector<2x8x8xf32>
    %311 = arith.mulf %306, %310 : vector<2x8x8xf32>
    %312 = arith.truncf %311 : vector<2x8x8xf32> to vector<2x8x8xbf16>
    %313 = arith.truncf %294 : vector<2x8x8xf32> to vector<2x8x8xbf16>
    "tpu.trace_start"() <{level = 10 : i32, message = "bqk,bkd->bqd"}> : () -> ()
    %cst_111 = arith.constant dense<0.000000e+00> : vector<2x8x8xf32>
    %314 = tpu.matmul %312, %313, %cst_111 {dimension_numbers = #tpu.dot_dimension_numbers<[2], [1], [1], [2], [0, 0, 0, 1, 1, 2], [0], [0]>} : vector<2x8x8xbf16>, vector<2x8x8xbf16>, vector<2x8x8xf32> -> vector<2x8x8xf32>
    "tpu.trace_stop"() : () -> ()
    %315 = tpu.concatenate %245, %268, %291, %314 in 2 : vector<2x8x8xf32>, vector<2x8x8xf32>, vector<2x8x8xf32>, vector<2x8x8xf32> -> vector<2x8x32xf32>
    %316 = vector.shape_cast %315 : vector<2x8x32xf32> to vector<16x32xf32>
    %317 = arith.truncf %316 : vector<16x32xf32> to vector<16x32xbf16>
    %c1_112 = arith.constant 1 : index
    %c0_113 = arith.constant 0 : index
    %c0_114 = arith.constant 0 : index
    %318 = vector.load %arg7[%c1_112, %c0_113, %c0_114] : memref<2x32x32xbf16, #tpu.memory_space<vmem>>, vector<1x32x32xbf16>
    %319 = vector.shape_cast %318 : vector<1x32x32xbf16> to vector<32x32xbf16>
    %cst_115 = arith.constant dense<0.000000e+00> : vector<16x32xf32>
    %320 = tpu.matmul %317, %319, %cst_115 {dimension_numbers = #tpu.dot_dimension_numbers<[1], [0], [0], [1], [0, 0, 1, 1], [], []>} : vector<16x32xbf16>, vector<32x32xbf16>, vector<16x32xf32> -> vector<16x32xf32>
    %c1_116 = arith.constant 1 : index
    %c0_117 = arith.constant 0 : index
    %c0_118 = arith.constant 0 : index
    %321 = vector.load %arg8[%c1_116, %c0_117, %c0_118] : memref<2x1x32xf32, #tpu.memory_space<vmem>>, vector<1x1x32xf32>
    %322 = vector.shape_cast %321 : vector<1x1x32xf32> to vector<1x32xf32>
    %323 = vector.broadcast %322 : vector<1x32xf32> to vector<16x32xf32>
    %324 = arith.addf %320, %323 : vector<16x32xf32>
    %325 = arith.addf %213, %324 : vector<16x32xf32>
    %c1_119 = arith.constant 1 : index
    %c0_120 = arith.constant 0 : index
    %c0_121 = arith.constant 0 : index
    %326 = vector.load %arg9[%c1_119, %c0_120, %c0_121] : memref<2x1x32xf32, #tpu.memory_space<vmem>>, vector<1x1x32xf32>
    %327 = vector.shape_cast %326 : vector<1x1x32xf32> to vector<1x32xf32>
    %c1_122 = arith.constant 1 : index
    %c0_123 = arith.constant 0 : index
    %c0_124 = arith.constant 0 : index
    %328 = vector.load %arg10[%c1_122, %c0_123, %c0_124] : memref<2x1x32xf32, #tpu.memory_space<vmem>>, vector<1x1x32xf32>
    %329 = vector.shape_cast %328 : vector<1x1x32xf32> to vector<1x32xf32>
    %cst_125 = arith.constant dense<0.000000e+00> : vector<16xf32>
    %330 = vector.multi_reduction <add>, %325, %cst_125 [1] : vector<16x32xf32> to vector<16xf32>
    %331 = vector.shape_cast %330 : vector<16xf32> to vector<16x1xf32>
    %cst_126 = arith.constant 3.200000e+01 : f32
    %332 = vector.broadcast %cst_126 : f32 to vector<16x1xf32>
    %333 = arith.divf %331, %332 : vector<16x1xf32>
    %334 = vector.broadcast %333 : vector<16x1xf32> to vector<16x32xf32>
    %335 = arith.subf %325, %334 : vector<16x32xf32>
    %336 = arith.mulf %335, %335 : vector<16x32xf32>
    %cst_127 = arith.constant dense<0.000000e+00> : vector<16xf32>
    %337 = vector.multi_reduction <add>, %336, %cst_127 [1] : vector<16x32xf32> to vector<16xf32>
    %338 = vector.shape_cast %337 : vector<16xf32> to vector<16x1xf32>
    %cst_128 = arith.constant 3.200000e+01 : f32
    %339 = vector.broadcast %cst_128 : f32 to vector<16x1xf32>
    %340 = arith.divf %338, %339 : vector<16x1xf32>
    %cst_129 = arith.constant 9.99999996E-13 : f32
    %341 = vector.broadcast %cst_129 : f32 to vector<16x1xf32>
    %342 = arith.addf %340, %341 : vector<16x1xf32>
    %343 = math.rsqrt %342 : vector<16x1xf32>
    %344 = vector.broadcast %343 : vector<16x1xf32> to vector<16x32xf32>
    %345 = arith.mulf %335, %344 : vector<16x32xf32>
    %346 = vector.broadcast %327 : vector<1x32xf32> to vector<16x32xf32>
    %347 = arith.mulf %345, %346 : vector<16x32xf32>
    %348 = vector.broadcast %329 : vector<1x32xf32> to vector<16x32xf32>
    %349 = arith.addf %347, %348 : vector<16x32xf32>
    %350 = arith.truncf %349 : vector<16x32xf32> to vector<16x32xbf16>
    %c1_130 = arith.constant 1 : index
    %c0_131 = arith.constant 0 : index
    %c0_132 = arith.constant 0 : index
    %351 = vector.load %arg11[%c1_130, %c0_131, %c0_132] : memref<2x32x64xbf16, #tpu.memory_space<vmem>>, vector<1x32x64xbf16>
    %352 = vector.shape_cast %351 : vector<1x32x64xbf16> to vector<32x64xbf16>
    %cst_133 = arith.constant dense<0.000000e+00> : vector<16x64xf32>
    %353 = tpu.matmul %350, %352, %cst_133 {dimension_numbers = #tpu.dot_dimension_numbers<[1], [0], [0], [1], [0, 0, 1, 1], [], []>} : vector<16x32xbf16>, vector<32x64xbf16>, vector<16x64xf32> -> vector<16x64xf32>
    %c1_134 = arith.constant 1 : index
    %c0_135 = arith.constant 0 : index
    %c0_136 = arith.constant 0 : index
    %354 = vector.load %arg12[%c1_134, %c0_135, %c0_136] : memref<2x1x64xf32, #tpu.memory_space<vmem>>, vector<1x1x64xf32>
    %355 = vector.shape_cast %354 : vector<1x1x64xf32> to vector<1x64xf32>
    %356 = vector.broadcast %355 : vector<1x64xf32> to vector<16x64xf32>
    %357 = arith.addf %353, %356 : vector<16x64xf32>
    %cst_137 = arith.constant 5.000000e-01 : f32
    %358 = vector.broadcast %cst_137 : f32 to vector<16x64xf32>
    %359 = arith.mulf %358, %357 : vector<16x64xf32>
    %cst_138 = arith.constant 4.471500e-02 : f32
    %360 = vector.broadcast %cst_138 : f32 to vector<16x64xf32>
    %361 = arith.mulf %360, %357 : vector<16x64xf32>
    %362 = arith.mulf %361, %357 : vector<16x64xf32>
    %363 = arith.mulf %362, %357 : vector<16x64xf32>
    %364 = arith.addf %357, %363 : vector<16x64xf32>
    %cst_139 = arith.constant 0.797884583 : f32
    %365 = vector.broadcast %cst_139 : f32 to vector<16x64xf32>
    %366 = arith.mulf %365, %364 : vector<16x64xf32>
    %367 = math.tanh %366 : vector<16x64xf32>
    %cst_140 = arith.constant 1.000000e+00 : f32
    %368 = vector.broadcast %cst_140 : f32 to vector<16x64xf32>
    %369 = arith.addf %368, %367 : vector<16x64xf32>
    %370 = arith.mulf %359, %369 : vector<16x64xf32>
    %371 = arith.truncf %370 : vector<16x64xf32> to vector<16x64xbf16>
    %c1_141 = arith.constant 1 : index
    %c0_142 = arith.constant 0 : index
    %c0_143 = arith.constant 0 : index
    %372 = vector.load %arg13[%c1_141, %c0_142, %c0_143] : memref<2x64x32xbf16, #tpu.memory_space<vmem>>, vector<1x64x32xbf16>
    %373 = vector.shape_cast %372 : vector<1x64x32xbf16> to vector<64x32xbf16>
    %cst_144 = arith.constant dense<0.000000e+00> : vector<16x32xf32>
    %374 = tpu.matmul %371, %373, %cst_144 {dimension_numbers = #tpu.dot_dimension_numbers<[1], [0], [0], [1], [0, 0, 1, 1], [], []>} : vector<16x64xbf16>, vector<64x32xbf16>, vector<16x32xf32> -> vector<16x32xf32>
    %c1_145 = arith.constant 1 : index
    %c0_146 = arith.constant 0 : index
    %c0_147 = arith.constant 0 : index
    %375 = vector.load %arg14[%c1_145, %c0_146, %c0_147] : memref<2x1x32xf32, #tpu.memory_space<vmem>>, vector<1x1x32xf32>
    %376 = vector.shape_cast %375 : vector<1x1x32xf32> to vector<1x32xf32>
    %377 = vector.broadcast %376 : vector<1x32xf32> to vector<16x32xf32>
    %378 = arith.addf %374, %377 : vector<16x32xf32>
    %379 = arith.addf %349, %378 : vector<16x32xf32>
    %c1_148 = arith.constant 1 : index
    %c0_149 = arith.constant 0 : index
    %c0_150 = arith.constant 0 : index
    %380 = vector.load %arg15[%c1_148, %c0_149, %c0_150] : memref<2x1x32xf32, #tpu.memory_space<vmem>>, vector<1x1x32xf32>
    %381 = vector.shape_cast %380 : vector<1x1x32xf32> to vector<1x32xf32>
    %c1_151 = arith.constant 1 : index
    %c0_152 = arith.constant 0 : index
    %c0_153 = arith.constant 0 : index
    %382 = vector.load %arg16[%c1_151, %c0_152, %c0_153] : memref<2x1x32xf32, #tpu.memory_space<vmem>>, vector<1x1x32xf32>
    %383 = vector.shape_cast %382 : vector<1x1x32xf32> to vector<1x32xf32>
    %cst_154 = arith.constant dense<0.000000e+00> : vector<16xf32>
    %384 = vector.multi_reduction <add>, %379, %cst_154 [1] : vector<16x32xf32> to vector<16xf32>
    %385 = vector.shape_cast %384 : vector<16xf32> to vector<16x1xf32>
    %cst_155 = arith.constant 3.200000e+01 : f32
    %386 = vector.broadcast %cst_155 : f32 to vector<16x1xf32>
    %387 = arith.divf %385, %386 : vector<16x1xf32>
    %388 = vector.broadcast %387 : vector<16x1xf32> to vector<16x32xf32>
    %389 = arith.subf %379, %388 : vector<16x32xf32>
    %390 = arith.mulf %389, %389 : vector<16x32xf32>
    %cst_156 = arith.constant dense<0.000000e+00> : vector<16xf32>
    %391 = vector.multi_reduction <add>, %390, %cst_156 [1] : vector<16x32xf32> to vector<16xf32>
    %392 = vector.shape_cast %391 : vector<16xf32> to vector<16x1xf32>
    %cst_157 = arith.constant 3.200000e+01 : f32
    %393 = vector.broadcast %cst_157 : f32 to vector<16x1xf32>
    %394 = arith.divf %392, %393 : vector<16x1xf32>
    %cst_158 = arith.constant 9.99999996E-13 : f32
    %395 = vector.broadcast %cst_158 : f32 to vector<16x1xf32>
    %396 = arith.addf %394, %395 : vector<16x1xf32>
    %397 = math.rsqrt %396 : vector<16x1xf32>
    %398 = vector.broadcast %397 : vector<16x1xf32> to vector<16x32xf32>
    %399 = arith.mulf %389, %398 : vector<16x32xf32>
    %400 = vector.broadcast %381 : vector<1x32xf32> to vector<16x32xf32>
    %401 = arith.mulf %399, %400 : vector<16x32xf32>
    %402 = vector.broadcast %383 : vector<1x32xf32> to vector<16x32xf32>
    %403 = arith.addf %401, %402 : vector<16x32xf32>
    %c0_159 = arith.constant 0 : index
    %c0_160 = arith.constant 0 : index
    %404 = vector.load %arg2[%c0_159, %c0_160] : memref<2x16xf32, #tpu.memory_space<vmem>>, vector<2x16xf32>
    %cst_161 = arith.constant dense<0.000000e+00> : vector<2x32xf32>
    %405 = tpu.matmul %404, %403, %cst_161 {dimension_numbers = #tpu.dot_dimension_numbers<[1], [0], [0], [1], [0, 0, 1, 1], [], []>} : vector<2x16xf32>, vector<16x32xf32>, vector<2x32xf32> -> vector<2x32xf32>
    %406 = arith.mulf %405, %405 : vector<2x32xf32>
    %cst_162 = arith.constant dense<0.000000e+00> : vector<2xf32>
    %407 = vector.multi_reduction <add>, %406, %cst_162 [1] : vector<2x32xf32> to vector<2xf32>
    %408 = vector.shape_cast %407 : vector<2xf32> to vector<2x1xf32>
    %cst_163 = arith.constant 1.000000e-24 : f32
    %409 = vector.broadcast %cst_163 : f32 to vector<2x1xf32>
    %410 = arith.maximumf %408, %409 : vector<2x1xf32>
    %411 = math.rsqrt %410 : vector<2x1xf32>
    %412 = vector.broadcast %411 : vector<2x1xf32> to vector<2x32xf32>
    %413 = arith.mulf %405, %412 : vector<2x32xf32>
    %c0_164 = arith.constant 0 : index
    %c0_165 = arith.constant 0 : index
    %414 = vector.load %arg17[%c0_164, %c0_165] : memref<2x32xf32, #tpu.memory_space<vmem>>, vector<2x32xf32>
    tpu.vector_store %arg17[%c0_164, %c0_165], %413 {strides = array<i32>} : memref<2x32xf32, #tpu.memory_space<vmem>>, vector<2x32xf32>,
    return
  }
}

</mosaic_0001>

<bundles_post_ra>
// kernel: unixcoder_forward.1
= control target key start
LH: loop header
LB: loop body
LE: loop exit
PB: predicated region body
PF: predicated region fallthrough
CT: control target
= control target key end

     0   :  { %s4236_s0 = inlined_call_operand.vmem [shape: f32[16,32], index: 0, kind: input, shape index: {}]   ;;  %s4237_s1 = inlined_call_operand.vmem [shape: f32[2,1,8], index: 1, kind: input, shape index: {}]   ;;  %s4238_s2 = inlined_call_operand.vmem [shape: f32[2,16], index: 2, kind: input, shape index: {}]   ;;  %s4239_s3 = inlined_call_operand.vmem [shape: f32[1,32], index: 3, kind: input, shape index: {}]   ;;  %s4240_s4 = inlined_call_operand.vmem [shape: f32[1,32], index: 4, kind: input, shape index: {}]   ;;  %s4241_s5 = inlined_call_operand.vmem [shape: bf16[2,32,96], index: 5, kind: input, shape index: {}]   ;;  %s4242_s6 = inlined_call_operand.vmem [shape: f32[2,1,96], index: 6, kind: input, shape index: {}]   ;;  %s4243_s7 = inlined_call_operand.vmem [shape: bf16[2,32,32], index: 7, kind: input, shape index: {}]   ;;  %s4244_s8 = inlined_call_operand.vmem [shape: f32[2,1,32], index: 8, kind: input, shape index: {}]   ;;  %s4245_s9 = inlined_call_operand.vmem [shape: f32[2,1,32], index: 9, kind: input, shape index: {}]   ;;  %s4246_s10 = inlined_call_operand.vmem [shape: f32[2,1,32], index: 10, kind: input, shape index: {}]   ;;  %s4247_s11 = inlined_call_operand.vmem [shape: bf16[2,32,64], index: 11, kind: input, shape index: {}]   ;;  %s4248_s12 = inlined_call_operand.vmem [shape: f32[2,1,64], index: 12, kind: input, shape index: {}]   ;;  %s4249_s13 = inlined_call_operand.vmem [shape: bf16[2,64,32], index: 13, kind: input, shape index: {}]   ;;  %s4250_s14 = inlined_call_operand.vmem [shape: f32[2,1,32], index: 14, kind: input, shape index: {}]   ;;  %s4251_s15 = inlined_call_operand.vmem [shape: f32[2,1,32], index: 15, kind: input, shape index: {}]   ;;  %s4252_s16 = inlined_call_operand.vmem [shape: f32[2,1,32], index: 16, kind: input, shape index: {}]   ;;  %s4253_s17 = inlined_call_operand.hbm [shape: f32[2,32], index: 17, kind: output, shape index: {}]  }
   0x1   :  { %4265 = sst [smem:[#allocation5_spill]] %s4236_s0 }
   0x2   :  { %4266 = sst [smem:[#allocation6_spill]] %s4237_s1 }
   0x3   :  { %s4267_s26 = sld [smem:[#allocation5_spill]]  ;;  %vm64_vm0 = vcmask 261120  }
   0x9   :  { %v60_v0 = vld [vmem:[%s4267_s26] sm:$0xff]  ;;  %v61_v1 = vld [vmem:[%s4267_s26 + $0x8] sm:$0xff] }
   0xa   :  { %v65_v2 = vsel %vm64_vm0, %v60_v0, 0.0  ;;  %v68_v3 = vsel %vm64_vm0, %v61_v1, 0.0 }
   0xb   :  { %66 = vadd.xlane.f32.xlu0 %v65_v2 }
   0xf   :  { %69 = vadd.xlane.f32.xlu0 %v68_v3 }
  0x10   :  { %22 = vsyncpa [#allocation3], 0  ;;  %v3404_v14 = vld [vmem:[%s4241_s5 + $0x8] sm:$0xff]   ;;  %v3542_v15 = vmov 0.0   ;;  %vm3543_vm1 = vmmov 0   ;;  %v3405_v16 = vld [vmem:[%s4241_s5] sm:$0xff]  }
  0x11   :  { %3086 = vmatprep.subr.bf16.mxu1 %v3542_v15  ;;  %3090 = vmatprep.mubr.msk.bf16.mxu1 %vm3543_vm1, %v3542_v15  ;;  %v2882_v25 = vld [vmem:[%s4239_s3] ss:$0 sm:$0xff]  ;;  %vm181_vm2 = vcmask 64512   ;;  %s4268_s25 = sld [smem:[#allocation6_spill]]  ;;  %s3545_s28 = smov 64   ;;  %vm322_vm3 = vcmask 1043456  }
  0x12   :  { %3087 = vmatpush3.bf16.msra.mxu1 %v3404_v14  ;;  %3100 = vmatprep.subr.bf16.mxu0 %v3542_v15  ;;  %v2883_v29 = vld [vmem:[%s4240_s4] ss:$0 sm:$0xff]  ;;  %s3544_s4 = smov 96   ;;  %s3546_s29 = smov 88   ;;  %vm1112_vm4 = vcmask 130048   ;;  %vm1115_vm5 = vcmask 195584  }
  0x13   :  { %3088 = vmatprep.subr.bf16.mxu1 %v3542_v15  ;;  %3102 = vmatprep.mubr.msk.bf16.mxu0 %vm3543_vm1, %v3542_v15  ;;  %v2884_v34 = vld [vmem:[%s4242_s6] ss:$0 sm:$0xff]  ;;  %s3547_s0 = smov 120   ;;  %s3548_s30 = smov 56   ;;  %vm1358_vm6 = vcmask 523264   ;;  %vm2860_vm7 = vcmask 254976  }
  0x14   :  { %s3549_s18 = smov 80   ;;  %s3550_s19 = smov 112  }
  0x15   :  { %s3551_s1 = smov 48   ;;  %s4263_s20 = smov 72  }
  0x16   :  { %3089 = vmatpush3.bf16.msra.mxu1 %v3405_v16  ;;  %s4261_s21 = smov 104   ;;  %s4259_s3 = smov 40  }
  0x17   :  { %3094 = vmatprep.subr.bf16.mxu1 %v3542_v15  ;;  %v3714_v48 = vld [vmem:[%s4268_s25] ss:$0 sm:$0xff]  ;;  %v3720_v54 = vld [vmem:[%s4268_s25 + $0x1] ss:$0 sm:$0xff]  ;;  %s4257_s22 = smov 8   ;;  %s4256_s23 = smov 16  }
  0x94   :  { %v67_v4 = vpop.xlane.xlu0 %66 }
  0x95   :  { %v72_v5 = vmul.f32 0.03125, %v67_v4 }
  0x97   :  { %v74_v6 = vsub.f32 %v60_v0, %v72_v5 }
  0x98   :  { %v70_v7 = vpop.xlane.xlu0 %69 }
  0x99   :  { %v73_v8 = vmul.f32 0.03125, %v70_v7  ;;  %v76_v9 = vmul.f32 %v74_v6, %v74_v6 }
  0x9b   :  { %v75_v10 = vsub.f32 %v61_v1, %v73_v8  ;;  %v78_v11 = vsel %vm64_vm0, %v76_v9, 0.0 }
  0x9c   :  { %79 = vadd.xlane.f32.xlu1 %v78_v11 }
  0x9d   :  { %v77_v12 = vmul.f32 %v75_v10, %v75_v10 }
  0x9f   :  { %v81_v13 = vsel %vm64_vm0, %v77_v12, 0.0 }
  0xa0   :  { %82 = vadd.xlane.f32.xlu1 %v81_v13 }
 0x125   :  { %v80_v17 = vpop.xlane.xlu1 %79 }
 0x126   :  { %v84_v18 = vmul.f32 0.03125, %v80_v17 }
 0x128   :  { %v86_v19 = vadd.f32 1e-12, %v84_v18 }
 0x129   :  { %v83_v20 = vpop.xlane.xlu1 %82 }
 0x12a   :  { %3424 = vrsqrt.f32 %v86_v19  ;;  %v85_v21 = vmul.f32 0.03125, %v83_v20 }
 0x12c   :  { %v87_v22 = vadd.f32 1e-12, %v85_v21 }
 0x12e   :  { %3426 = vrsqrt.f32 %v87_v22 }
 0x137   :  { %v3425_v23 = vpop.eup %3424 }
 0x138   :  { %v90_v24 = vmul.f32 %v3425_v23, %v74_v6 }
 0x13a   :  { %v98_v28 = vmul.f32 %v2882_v25, %v90_v24 }
 0x13b   :  { %v3427_v26 = vpop.eup %3426 }
 0x13c   :  { %v91_v27 = vmul.f32 %v3427_v26, %v75_v10  ;;  %v3679_v31 = vadd.f32 %v2883_v29, %v98_v28 }
 0x13e   :  { %v99_v30 = vmul.f32 %v2882_v25, %v91_v27 }
 0x140   :  { %v3681_v32 = vadd.f32 %v2883_v29, %v99_v30 }
 0x142   :  { %v108_v33 = vpack.c.bf16 %v3681_v32, %v3679_v31 }
 0x144   :  { %3091 = vmatmul.mubr.msk.bf16.vlgmr.msra.gmra.mxu1 %vm64_vm0, %v108_v33 }
 0x145   :  { %3096 = vmatprep.mubr.msk.bf16.mxu1 %vm3543_vm1, %v3542_v15 }
 0x204   :  { %v169_v35 = vpop.f32.mrf.mxu1 }
 0x205   :  { %v170_v36 = vadd.f32 %v2884_v34, %v169_v35 }
 0x206   :  { %v3092_v37 = vpop.f32.mrf.mxu1 }
 0x207   :  { %v3691_v38 = vpack.c.bf16 %v170_v36, %v170_v36 }
 0x208   :  { %v172_v39 = vpop.f32.mrf.mxu1 }
 0x209   :  { %v173_v40 = vadd.f32 %v2884_v34, %v172_v39  ;;  %179 = vrot.lane.b32.xlu0 %v3691_v38, %s3544_s4 }
 0x20a   :  { %v3093_v41 = vpop.f32.mrf.mxu1 }
 0x20b   :  { %v3695_v42 = vpack.c.bf16 %v173_v40, %v173_v40 }
 0x20d   :  { %229 = vrot.lane.b32.xlu1 %v3695_v42, %s3544_s4 }
 0x27b   :  { %v180_v43 = vpop.permute.xlu0 %179 }
 0x27c   :  { %v186_v44 = vsel %vm181_vm2, %v180_v43, 0 }
 0x27d   :  { %3095 = vmatpush3.bf16.xpose.msra.mxu1 %v186_v44 }
 0x27e   :  { %3106 = vmatprep.subr.bf16.mxu1 %v3542_v15 }
 0x27f   :  { %v230_v45 = vpop.permute.xlu1 %229 }
 0x280   :  { %v235_v46 = vsel %vm181_vm2, %v230_v45, 0 }
 0x281   :  { %3101 = vmatpush3.bf16.xpose.msra.mxu0 %v235_v46 }
 0x282   :  { %3112 = vmatprep.subr.bf16.mxu0 %v3542_v15 }
 0x284   :  { %3097 = vmatmul.mubr.msk.bf16.vlgmr.msra.gmra.mxu1 %vm181_vm2, %v3691_v38 }
 0x285   :  { %3108 = vmatprep.mubr.msk.bf16.mxu1 %vm3543_vm1, %v3542_v15 }
 0x288   :  { %3103 = vmatmul.mubr.msk.bf16.vlgmr.msra.gmra.mxu0 %vm181_vm2, %v3695_v42 }
 0x289   :  { %3114 = vmatprep.mubr.msk.bf16.mxu0 %vm3543_vm1, %v3542_v15 }
 0x344   :  { %v222_v47 = vpop.f32.mrf.mxu1 }
 0x345   :  { %v277_v49 = vmul.f32 0.35355338, %v222_v47 }
 0x346   :  { %v3098_v50 = vpop.f32.mrf.mxu1 }
 0x347   :  { %v291_v51 = vadd.f32 %v3714_v48, %v277_v49 }
 0x348   :  { %v225_v52 = vpop.f32.mrf.mxu1  ;;  %v271_v53 = vpop.f32.mrf.mxu0 }
 0x349   :  { %v278_v55 = vmul.f32 0.35355338, %v271_v53  ;;  %v293_v56 = vsel %vm181_vm2, %v291_v51, -inf }
 0x34a   :  { %v3099_v57 = vpop.f32.mrf.mxu1  ;;  %v3104_v58 = vpop.f32.mrf.mxu0  ;;  %294 = vmax.xlane.f32.xlu1 %v293_v56 }
 0x34b   :  { %v292_v59 = vadd.f32 %v3720_v54, %v278_v55 }
 0x34c   :  { %v274_v60 = vpop.f32.mrf.mxu0 }
 0x34d   :  { %v296_v61 = vsel %vm181_vm2, %v292_v59, -inf }
 0x34e   :  { %v3105_v62 = vpop.f32.mrf.mxu0  ;;  %297 = vmax.xlane.f32.xlu0 %v296_v61 }
 0x35b   :  { %366 = vrot.lane.b32.xlu1 %v3695_v42, %s3545_s28 }
 0x35f   :  { %416 = vrot.lane.b32.xlu1 %v3691_v38, %s3546_s29 }
 0x3d3   :  { %v295_v63 = vpop.xlane.xlu1 %294 }
 0x3d4   :  { %v299_v0 = vsub.f32 %v291_v51, %v295_v63 }
 0x3d6   :  { %v301_v1 = vmul.f32 1.442695, %v299_v0 }
 0x3d7   :  { %v298_v2 = vpop.xlane.xlu0 %297  ;;  %v367_v3 = vpop.permute.xlu1 %366 }
 0x3d8   :  { %3428 = vpow2.f32 %v301_v1  ;;  %v300_v4 = vsub.f32 %v292_v59, %v298_v2  ;;  %v372_v5 = vsel %vm322_vm3, %v367_v3, 0 }
 0x3d9   :  { %3113 = vmatpush3.bf16.msra.mxu0 %v372_v5 }
 0x3da   :  { %v303_v6 = vmul.f32 1.442695, %v300_v4  ;;  %3124 = vmatprep.subr.bf16.mxu0 %v3542_v15 }
 0x3db   :  { %v417_v11 = vpop.permute.xlu1 %416 }
 0x3dc   :  { %3430 = vpow2.f32 %v303_v6  ;;  %v422_v21 = vsel %vm181_vm2, %v417_v11, 0 }
 0x3e5   :  { %v3429_v7 = vpop.eup %3428 }
 0x3e6   :  { %v305_v8 = vsel %vm181_vm2, %v3429_v7, 0.0 }
 0x3e7   :  { %306 = vadd.xlane.f32.xlu0 %v305_v8 }
 0x3e9   :  { %v3431_v9 = vpop.eup %3430 }
 0x3ea   :  { %v308_v10 = vsel %vm181_vm2, %v3431_v9, 0.0 }
 0x3eb   :  { %309 = vadd.xlane.f32.xlu1 %v308_v10 }
 0x3fc   :  { %466 = vrot.lane.b32.xlu1 %v3695_v42, %s3546_s29 }
 0x3fd   :  { %317 = vrot.lane.b32.xlu0 %v3691_v38, %s3545_s28 }
 0x400   :  { %464 = vrot.lane.b32.xlu1 %v3695_v42, %s3547_s0 }
 0x401   :  { %414 = vrot.lane.b32.xlu0 %v3691_v38, %s3547_s0 }
 0x470   :  { %v307_v12 = vpop.xlane.xlu0 %306 }
 0x471   :  { %3432 = vrcp.f32 %v307_v12 }
 0x474   :  { %v318_v13 = vpop.permute.xlu0 %317  ;;  %v310_v14 = vpop.xlane.xlu1 %309 }
 0x475   :  { %v324_v16 = vsel %vm322_vm3, %v318_v13, 0  ;;  %3434 = vrcp.f32 %v310_v14 }
 0x476   :  { %3107 = vmatpush3.bf16.msra.mxu1 %v324_v16 }
 0x477   :  { %3118 = vmatprep.subr.bf16.mxu1 %v3542_v15 }
 0x478   :  { %v467_v23 = vpop.permute.xlu1 %466  ;;  %v415_v26 = vpop.permute.xlu0 %414 }
 0x479   :  { %v472_v25 = vsel %vm181_vm2, %v467_v23, 0 }
 0x47c   :  { %v465_v27 = vpop.permute.xlu1 %464 }
 0x47e   :  { %v3433_v17 = vpop.eup %3432 }
 0x47f   :  { %v313_v18 = vmul.f32 %v3433_v17, %v3429_v7 }
 0x481   :  { %v315_v19 = vpack.c.bf16 %v313_v18, %v313_v18 }
 0x482   :  { %v3435_v20 = vpop.eup %3434 }
 0x483   :  { %3109 = vmatmul.mubr.msk.bf16.vlgmr.msra.gmra.mxu1 %vm181_vm2, %v315_v19  ;;  %v314_v22 = vmul.f32 %v3435_v20, %v3431_v9 }
 0x484   :  { %3119 = vmatpush3.bf16.xpose.msra.mxu1 %v422_v21  ;;  %3120 = vmatprep.mubr.msk.bf16.mxu1 %vm3543_vm1, %v3542_v15 }
 0x485   :  { %v316_v24 = vpack.c.bf16 %v314_v22, %v314_v22  ;;  %3130 = vmatprep.subr.bf16.mxu1 %v3542_v15 }
 0x487   :  { %3115 = vmatmul.mubr.msk.bf16.vlgmr.msra.gmra.mxu0 %vm181_vm2, %v316_v24 }
 0x488   :  { %3125 = vmatpush3.bf16.xpose.msra.mxu0 %v472_v25  ;;  %3126 = vmatprep.mubr.msk.bf16.mxu0 %vm3543_vm1, %v3542_v15 }
 0x489   :  { %3136 = vmatprep.subr.bf16.mxu0 %v3542_v15 }
 0x48b   :  { %3121 = vmatmul.mubr.msk.bf16.vlgmr.msra.gmra.mxu1 %vm181_vm2, %v415_v26 }
 0x48c   :  { %3132 = vmatprep.mubr.msk.bf16.mxu1 %vm3543_vm1, %v3542_v15 }
 0x48f   :  { %3127 = vmatmul.mubr.msk.bf16.vlgmr.msra.gmra.mxu0 %vm181_vm2, %v465_v27 }
 0x490   :  { %3138 = vmatprep.mubr.msk.bf16.mxu0 %vm3543_vm1, %v3542_v15 }
 0x543   :  { %v3759_v28 = vpop.f32.mrf.mxu1 }
 0x545   :  { %v3110_v29 = vpop.f32.mrf.mxu1 }
 0x547   :  { %v363_v30 = vpop.f32.mrf.mxu1  ;;  %v3761_v33 = vpop.f32.mrf.mxu0 }
 0x549   :  { %v3111_v34 = vpop.f32.mrf.mxu1  ;;  %v3116_v35 = vpop.f32.mrf.mxu0 }
 0x54b   :  { %v411_v36 = vpop.f32.mrf.mxu0  ;;  %v458_v37 = vpop.f32.mrf.mxu1 }
 0x54c   :  { %v514_v39 = vmul.f32 0.35355338, %v458_v37 }
 0x54d   :  { %v3117_v40 = vpop.f32.mrf.mxu0  ;;  %v3122_v41 = vpop.f32.mrf.mxu1 }
 0x54e   :  { %v516_v43 = vadd.f32 %v3714_v48, %v514_v39 }
 0x54f   :  { %v461_v44 = vpop.f32.mrf.mxu1  ;;  %v508_v45 = vpop.f32.mrf.mxu0 }
 0x550   :  { %v515_v46 = vmul.f32 0.35355338, %v508_v45  ;;  %v518_v47 = vsel %vm181_vm2, %v516_v43, -inf }
 0x551   :  { %519 = vmax.xlane.f32.xlu0 %v518_v47  ;;  %v3123_v49 = vpop.f32.mrf.mxu1  ;;  %v3128_v50 = vpop.f32.mrf.mxu0 }
 0x552   :  { %v517_v51 = vadd.f32 %v3720_v54, %v515_v46 }
 0x553   :  { %v511_v52 = vpop.f32.mrf.mxu0 }
 0x554   :  { %v521_v53 = vsel %vm181_vm2, %v517_v51, -inf }
 0x555   :  { %522 = vmax.xlane.f32.xlu1 %v521_v53  ;;  %v3129_v55 = vpop.f32.mrf.mxu0 }
 0x566   :  { %590 = vrot.lane.b32.xlu1 %v3695_v42, %s3548_s30 }
 0x56a   :  { %640 = vrot.lane.b32.xlu1 %v3691_v38, %s3549_s18 }
 0x56e   :  { %690 = vrot.lane.b32.xlu1 %v3695_v42, %s3549_s18 }
 0x572   :  { %688 = vrot.lane.b32.xlu1 %v3695_v42, %s3550_s19 }
 0x5da   :  { %v520_v56 = vpop.xlane.xlu0 %519 }
 0x5db   :  { %v524_v57 = vsub.f32 %v516_v43, %v520_v56 }
 0x5dd   :  { %v526_v58 = vmul.f32 1.442695, %v524_v57 }
 0x5de   :  { %v523_v59 = vpop.xlane.xlu1 %522 }
 0x5df   :  { %3436 = vpow2.f32 %v526_v58  ;;  %v525_v60 = vsub.f32 %v517_v51, %v523_v59 }
 0x5e1   :  { %v528_v61 = vmul.f32 1.442695, %v525_v60 }
 0x5e2   :  { %v591_v62 = vpop.permute.xlu1 %590 }
 0x5e3   :  { %3438 = vpow2.f32 %v528_v61  ;;  %v596_v63 = vsel %vm322_vm3, %v591_v62, 0 }
 0x5e4   :  { %3137 = vmatpush3.bf16.msra.mxu0 %v596_v63 }
 0x5e5   :  { %3148 = vmatprep.subr.bf16.mxu0 %v3542_v15 }
 0x5e6   :  { %v641_v9 = vpop.permute.xlu1 %640 }
 0x5e7   :  { %v646_v13 = vsel %vm181_vm2, %v641_v9, 0 }
 0x5ea   :  { %v691_v16 = vpop.permute.xlu1 %690 }
 0x5eb   :  { %v696_v18 = vsel %vm181_vm2, %v691_v16, 0 }
 0x5ec   :  { %v3437_v0 = vpop.eup %3436 }
 0x5ed   :  { %v530_v1 = vsel %vm181_vm2, %v3437_v0, 0.0 }
 0x5ee   :  { %531 = vadd.xlane.f32.xlu0 %v530_v1  ;;  %v689_v20 = vpop.permute.xlu1 %688 }
 0x5f0   :  { %v3439_v2 = vpop.eup %3438 }
 0x5f1   :  { %v533_v3 = vsel %vm181_vm2, %v3439_v2, 0.0 }
 0x5f2   :  { %534 = vadd.xlane.f32.xlu0 %v533_v3 }
 0x608   :  { %542 = vrot.lane.b32.xlu0 %v3691_v38, %s3548_s30 }
 0x60c   :  { %638 = vrot.lane.b32.xlu0 %v3691_v38, %s3550_s19 }
 0x677   :  { %v532_v4 = vpop.xlane.xlu0 %531 }
 0x678   :  { %3440 = vrcp.f32 %v532_v4 }
 0x67b   :  { %v535_v5 = vpop.xlane.xlu0 %534 }
 0x67c   :  { %3442 = vrcp.f32 %v535_v5 }
 0x67f   :  { %v543_v6 = vpop.permute.xlu0 %542 }
 0x680   :  { %v548_v7 = vsel %vm322_vm3, %v543_v6, 0 }
 0x681   :  { %3131 = vmatpush3.bf16.msra.mxu1 %v548_v7 }
 0x682   :  { %3142 = vmatprep.subr.bf16.mxu1 %v3542_v15 }
 0x683   :  { %v639_v19 = vpop.permute.xlu0 %638 }
 0x685   :  { %v3441_v8 = vpop.eup %3440 }
 0x686   :  { %v538_v10 = vmul.f32 %v3441_v8, %v3437_v0 }
 0x688   :  { %v540_v11 = vpack.c.bf16 %v538_v10, %v538_v10 }
 0x689   :  { %v3443_v12 = vpop.eup %3442 }
 0x68a   :  { %3133 = vmatmul.mubr.msk.bf16.vlgmr.msra.gmra.mxu1 %vm181_vm2, %v540_v11  ;;  %v539_v14 = vmul.f32 %v3443_v12, %v3439_v2 }
 0x68b   :  { %3143 = vmatpush3.bf16.xpose.msra.mxu1 %v646_v13  ;;  %3144 = vmatprep.mubr.msk.bf16.mxu1 %vm3543_vm1, %v3542_v15 }
 0x68c   :  { %v541_v17 = vpack.c.bf16 %v539_v14, %v539_v14  ;;  %3154 = vmatprep.subr.bf16.mxu1 %v3542_v15 }
 0x68e   :  { %3139 = vmatmul.mubr.msk.bf16.vlgmr.msra.gmra.mxu0 %vm181_vm2, %v541_v17 }
 0x68f   :  { %3149 = vmatpush3.bf16.xpose.msra.mxu0 %v696_v18  ;;  %3150 = vmatprep.mubr.msk.bf16.mxu0 %vm3543_vm1, %v3542_v15 }
 0x690   :  { %3160 = vmatprep.subr.bf16.mxu0 %v3542_v15 }
 0x692   :  { %3145 = vmatmul.mubr.msk.bf16.vlgmr.msra.gmra.mxu1 %vm181_vm2, %v639_v19 }
 0x693   :  { %3156 = vmatprep.mubr.msk.bf16.mxu1 %vm3543_vm1, %v3542_v15 }
 0x696   :  { %3151 = vmatmul.mubr.msk.bf16.vlgmr.msra.gmra.mxu0 %vm181_vm2, %v689_v20 }
 0x697   :  { %3162 = vmatprep.mubr.msk.bf16.mxu0 %vm3543_vm1, %v3542_v15 }
 0x74a   :  { %v3801_v21 = vpop.f32.mrf.mxu1 }
 0x74c   :  { %v3134_v22 = vpop.f32.mrf.mxu1 }
 0x74e   :  { %v587_v23 = vpop.f32.mrf.mxu1  ;;  %v3803_v24 = vpop.f32.mrf.mxu0 }
 0x74f   :  { %v3374_v25 = vpack.i.bf16 %v3803_v24, %v3801_v21 }
 0x750   :  { %v3135_v26 = vpop.f32.mrf.mxu1  ;;  %v3140_v27 = vpop.f32.mrf.mxu0 }
 0x752   :  { %v635_v29 = vpop.f32.mrf.mxu0  ;;  %v682_v30 = vpop.f32.mrf.mxu1 }
 0x753   :  { %v738_v34 = vmul.f32 0.35355338, %v682_v30 }
 0x754   :  { %v3141_v35 = vpop.f32.mrf.mxu0  ;;  %v3146_v36 = vpop.f32.mrf.mxu1 }
 0x755   :  { %v740_v37 = vadd.f32 %v3714_v48, %v738_v34 }
 0x756   :  { %v685_v39 = vpop.f32.mrf.mxu1  ;;  %v732_v40 = vpop.f32.mrf.mxu0 }
 0x757   :  { %v739_v41 = vmul.f32 0.35355338, %v732_v40  ;;  %v742_v43 = vsel %vm181_vm2, %v740_v37, -inf }
 0x758   :  { %743 = vmax.xlane.f32.xlu0 %v742_v43  ;;  %v3147_v44 = vpop.f32.mrf.mxu1  ;;  %v3152_v45 = vpop.f32.mrf.mxu0 }
 0x759   :  { %v741_v46 = vadd.f32 %v3720_v54, %v739_v41 }
 0x75a   :  { %v735_v47 = vpop.f32.mrf.mxu0 }
 0x75b   :  { %v745_v49 = vsel %vm181_vm2, %v741_v46, -inf }
 0x75c   :  { %746 = vmax.xlane.f32.xlu1 %v745_v49  ;;  %v3153_v50 = vpop.f32.mrf.mxu0 }
 0x76d   :  { %814 = vrot.lane.b32.xlu1 %v3695_v42, %s3551_s1 }
 0x771   :  { %864 = vrot.lane.b32.xlu1 %v3691_v38, %s4263_s20 }
 0x775   :  { %914 = vrot.lane.b32.xlu1 %v3695_v42, %s4263_s20 }
 0x779   :  { %912 = vrot.lane.b32.xlu1 %v3695_v42, %s4261_s21 }
 0x7e1   :  { %v744_v51 = vpop.xlane.xlu0 %743 }
 0x7e2   :  { %v748_v52 = vsub.f32 %v740_v37, %v744_v51 }
 0x7e4   :  { %v750_v53 = vmul.f32 1.442695, %v748_v52 }
 0x7e5   :  { %v747_v55 = vpop.xlane.xlu1 %746 }
 0x7e6   :  { %3444 = vpow2.f32 %v750_v53  ;;  %v749_v56 = vsub.f32 %v741_v46, %v747_v55 }
 0x7e8   :  { %v752_v57 = vmul.f32 1.442695, %v749_v56 }
 0x7e9   :  { %v815_v58 = vpop.permute.xlu1 %814 }
 0x7ea   :  { %3446 = vpow2.f32 %v752_v57  ;;  %v820_v59 = vsel %vm322_vm3, %v815_v58, 0 }
 0x7eb   :  { %3161 = vmatpush3.bf16.msra.mxu0 %v820_v59 }
 0x7ec   :  { %3172 = vmatprep.subr.bf16.mxu0 %v3542_v15 }
 0x7ed   :  { %v865_v5 = vpop.permute.xlu1 %864 }
 0x7ee   :  { %v870_v9 = vsel %vm181_vm2, %v865_v5, 0 }
 0x7f1   :  { %v915_v11 = vpop.permute.xlu1 %914 }
 0x7f2   :  { %v920_v13 = vsel %vm181_vm2, %v915_v11, 0 }
 0x7f3   :  { %v3445_v60 = vpop.eup %3444 }
 0x7f4   :  { %v754_v61 = vsel %vm181_vm2, %v3445_v60, 0.0 }
 0x7f5   :  { %755 = vadd.xlane.f32.xlu0 %v754_v61  ;;  %v913_v16 = vpop.permute.xlu1 %912 }
 0x7f7   :  { %v3447_v62 = vpop.eup %3446 }
 0x7f8   :  { %v757_v63 = vsel %vm181_vm2, %v3447_v62, 0.0 }
 0x7f9   :  { %758 = vadd.xlane.f32.xlu0 %v757_v63 }
 0x80f   :  { %766 = vrot.lane.b32.xlu0 %v3691_v38, %s3551_s1 }
 0x813   :  { %862 = vrot.lane.b32.xlu0 %v3691_v38, %s4261_s21 }
 0x87e   :  { %v756_v0 = vpop.xlane.xlu0 %755 }
 0x87f   :  { %3448 = vrcp.f32 %v756_v0 }
 0x882   :  { %v759_v1 = vpop.xlane.xlu0 %758 }
 0x883   :  { %3450 = vrcp.f32 %v759_v1 }
 0x886   :  { %v767_v2 = vpop.permute.xlu0 %766 }
 0x887   :  { %v772_v3 = vsel %vm322_vm3, %v767_v2, 0  ;;  %v3406_v2 = vld [vmem:[%s4243_s7 + $0x8] sm:$0xff]  }
 0x888   :  { %3155 = vmatpush3.bf16.msra.mxu1 %v772_v3  ;;  %v3407_v3 = vld [vmem:[%s4243_s7] sm:$0xff]  }
 0x889   :  { %3166 = vmatprep.subr.bf16.mxu1 %v3542_v15 }
 0x88a   :  { %v863_v14 = vpop.permute.xlu0 %862 }
 0x88c   :  { %v3449_v4 = vpop.eup %3448 }
 0x88d   :  { %v762_v6 = vmul.f32 %v3449_v4, %v3445_v60 }
 0x88f   :  { %v764_v7 = vpack.c.bf16 %v762_v6, %v762_v6 }
 0x890   :  { %v3451_v8 = vpop.eup %3450 }
 0x891   :  { %3157 = vmatmul.mubr.msk.bf16.vlgmr.msra.gmra.mxu1 %vm181_vm2, %v764_v7  ;;  %v763_v10 = vmul.f32 %v3451_v8, %v3447_v62 }
 0x892   :  { %3167 = vmatpush3.bf16.xpose.msra.mxu1 %v870_v9  ;;  %3168 = vmatprep.mubr.msk.bf16.mxu1 %vm3543_vm1, %v3542_v15 }
 0x893   :  { %v765_v12 = vpack.c.bf16 %v763_v10, %v763_v10  ;;  %3178 = vmatprep.subr.bf16.mxu1 %v3542_v15 }
 0x895   :  { %3163 = vmatmul.mubr.msk.bf16.vlgmr.msra.gmra.mxu0 %vm181_vm2, %v765_v12 }
 0x896   :  { %3173 = vmatpush3.bf16.xpose.msra.mxu0 %v920_v13  ;;  %3174 = vmatprep.mubr.msk.bf16.mxu0 %vm3543_vm1, %v3542_v15 }
 0x897   :  { %3184 = vmatprep.subr.bf16.mxu0 %v3542_v15 }
 0x899   :  { %3169 = vmatmul.mubr.msk.bf16.vlgmr.msra.gmra.mxu1 %vm181_vm2, %v863_v14 }
 0x89a   :  { %3180 = vmatprep.mubr.msk.bf16.mxu1 %vm3543_vm1, %v3542_v15 }
 0x89d   :  { %3175 = vmatmul.mubr.msk.bf16.vlgmr.msra.gmra.mxu0 %vm181_vm2, %v913_v16 }
 0x89e   :  { %3186 = vmatprep.mubr.msk.bf16.mxu0 %vm3543_vm1, %v3542_v15 }
 0x951   :  { %v808_v17 = vpop.f32.mrf.mxu1 }
 0x953   :  { %v3158_v18 = vpop.f32.mrf.mxu1 }
 0x955   :  { %v811_v19 = vpop.f32.mrf.mxu1  ;;  %v856_v20 = vpop.f32.mrf.mxu0 }
 0x957   :  { %v3159_v22 = vpop.f32.mrf.mxu1  ;;  %v3164_v23 = vpop.f32.mrf.mxu0 }
 0x959   :  { %v859_v26 = vpop.f32.mrf.mxu0  ;;  %v906_v27 = vpop.f32.mrf.mxu1 }
 0x95a   :  { %v962_v29 = vmul.f32 0.35355338, %v906_v27 }
 0x95b   :  { %v3165_v30 = vpop.f32.mrf.mxu0  ;;  %v3170_v34 = vpop.f32.mrf.mxu1 }
 0x95c   :  { %v964_v35 = vadd.f32 %v3714_v48, %v962_v29  ;;  %v3379_v48 = vpack.i.bf16 %v856_v20, %v808_v17 }
 0x95d   :  { %v909_v36 = vpop.f32.mrf.mxu1  ;;  %v956_v37 = vpop.f32.mrf.mxu0 }
 0x95e   :  { %v963_v39 = vmul.f32 0.35355338, %v956_v37  ;;  %v966_v40 = vsel %vm181_vm2, %v964_v35, -inf }
 0x95f   :  { %967 = vmax.xlane.f32.xlu0 %v966_v40  ;;  %v3171_v41 = vpop.f32.mrf.mxu1  ;;  %v3176_v43 = vpop.f32.mrf.mxu0 }
 0x960   :  { %v965_v44 = vadd.f32 %v3720_v54, %v963_v39 }
 0x961   :  { %v959_v45 = vpop.f32.mrf.mxu0 }
 0x962   :  { %v969_v46 = vsel %vm181_vm2, %v965_v44, -inf }
 0x963   :  { %970 = vmax.xlane.f32.xlu1 %v969_v46  ;;  %v3177_v47 = vpop.f32.mrf.mxu0 }
 0x974   :  { %1038 = vrot.lane.b32.xlu1 %v3695_v42, %s4259_s3 }
 0x978   :  { %3375 = vrot.lane.b32.xlu1 %v3374_v25, %s4257_s22  ;;  %s4258_s22 = smov 24  }
 0x97c   :  { %3380 = vrot.lane.b32.xlu1 %v3379_v48, %s4256_s23 }
 0x9e8   :  { %v968_v54 = vpop.xlane.xlu0 %967 }
 0x9e9   :  { %v972_v49 = vsub.f32 %v964_v35, %v968_v54 }
 0x9eb   :  { %v974_v50 = vmul.f32 1.442695, %v972_v49 }
 0x9ec   :  { %v971_v51 = vpop.xlane.xlu1 %970 }
 0x9ed   :  { %3452 = vpow2.f32 %v974_v50  ;;  %v973_v52 = vsub.f32 %v965_v44, %v971_v51 }
 0x9ef   :  { %v976_v53 = vmul.f32 1.442695, %v973_v52 }
 0x9f0   :  { %v1039_v55 = vpop.permute.xlu1 %1038 }
 0x9f1   :  { %3454 = vpow2.f32 %v976_v53  ;;  %v1044_v42 = vsel %vm322_vm3, %v1039_v55, 0 }
 0x9f2   :  { %3185 = vmatpush3.bf16.msra.mxu0 %v1044_v42 }
 0x9f3   :  { %3198 = vmatprep.subr.bf16.mxu0 %v3542_v15 }
 0x9f4   :  { %v3376_v13 = vpop.permute.xlu1 %3375 }
 0x9f5   :  { %v3378_v16 = vunpack.i.h.bf16 %v3376_v13  ;;  %v3377_v17 = vunpack.i.l.bf16 %v3376_v13 }
 0x9f7   :  { %v1111_v22 = vsel %vm181_vm2, %v3761_v33, %v3378_v16  ;;  %v1110_v23 = vsel %vm181_vm2, %v3759_v28, %v3377_v17  ;;  %v2906_v28 = vld [vmem:[%s4244_s8] ss:$0 sm:$0xff] }
 0x9f8   :  { %v3381_v14 = vpop.permute.xlu1 %3380 }
 0x9f9   :  { %v3383_v18 = vunpack.i.h.bf16 %v3381_v14  ;;  %v3382_v19 = vunpack.i.l.bf16 %v3381_v14 }
 0x9fa   :  { %v3453_v21 = vpop.eup %3452 }
 0x9fb   :  { %v978_v24 = vsel %vm181_vm2, %v3453_v21, 0.0  ;;  %v1113_v29 = vsel %vm1112_vm4, %v1110_v23, %v3382_v19  ;;  %v1114_v30 = vsel %vm1112_vm4, %v1111_v22, %v3383_v18 }
 0x9fc   :  { %979 = vadd.xlane.f32.xlu0 %v978_v24 }
 0x9fe   :  { %v3455_v25 = vpop.eup %3454 }
 0x9ff   :  { %v981_v56 = vsel %vm181_vm2, %v3455_v25, 0.0 }
 0xa00   :  { %982 = vadd.xlane.f32.xlu0 %v981_v56 }
 0xa16   :  { %990 = vrot.lane.b32.xlu0 %v3691_v38, %s4259_s3  ;;  %s4274_s3 = smov 24  }
 0xa85   :  { %v980_v57 = vpop.xlane.xlu0 %979 }
 0xa86   :  { %3456 = vrcp.f32 %v980_v57 }
 0xa89   :  { %v983_v58 = vpop.xlane.xlu0 %982 }
 0xa8a   :  { %3458 = vrcp.f32 %v983_v58 }
 0xa8d   :  { %v991_v59 = vpop.permute.xlu0 %990 }
 0xa8e   :  { %v996_v60 = vsel %vm322_vm3, %v991_v59, 0 }
 0xa8f   :  { %3179 = vmatpush3.bf16.msra.mxu1 %v996_v60 }
 0xa90   :  { %3190 = vmatprep.subr.bf16.mxu1 %v3542_v15 }
 0xa93   :  { %v3457_v61 = vpop.eup %3456 }
 0xa94   :  { %v986_v62 = vmul.f32 %v3457_v61, %v3453_v21  ;;  %v3409_v21 = vld [vmem:[%s4247_s11] sm:$0xff]  }
 0xa96   :  { %v988_v63 = vpack.c.bf16 %v986_v62, %v986_v62  ;;  %v2910_v62 = vld [vmem:[%s4245_s9] ss:$0 sm:$0xff] }
 0xa97   :  { %v3459_v0 = vpop.eup %3458 }
 0xa98   :  { %3181 = vmatmul.mubr.msk.bf16.vlgmr.msra.gmra.mxu1 %vm181_vm2, %v988_v63  ;;  %v987_v1 = vmul.f32 %v3459_v0, %v3455_v25 }
 0xa99   :  { %3194 = vmatprep.mubr.msk.bf16.mxu1 %vm3543_vm1, %v3542_v15  ;;  %3191 = vmatpush3.bf16.msra.mxu1 %v3406_v2 }
 0xa9a   :  { %v989_v38 = vpack.c.bf16 %v987_v1, %v987_v1  ;;  %3192 = vmatprep.subr.bf16.mxu1 %v3542_v15 }
 0xa9c   :  { %3187 = vmatmul.mubr.msk.bf16.vlgmr.msra.gmra.mxu0 %vm181_vm2, %v989_v38  ;;  %v2911_v38 = vld [vmem:[%s4246_s10] ss:$0 sm:$0xff] }
 0xa9d   :  { %3202 = vmatprep.mubr.msk.bf16.mxu0 %vm3543_vm1, %v3542_v15  ;;  %3193 = vmatpush3.bf16.msra.mxu1 %v3407_v3 }
 0xa9e   :  { %3206 = vmatprep.subr.bf16.mxu1 %v3542_v15 }
 0xb58   :  { %v1032_v4 = vpop.f32.mrf.mxu1 }
 0xb5a   :  { %v3182_v5 = vpop.f32.mrf.mxu1 }
 0xb5c   :  { %v1035_v6 = vpop.f32.mrf.mxu1  ;;  %v1080_v7 = vpop.f32.mrf.mxu0 }
 0xb5d   :  { %v3384_v8 = vpack.i.bf16 %v1080_v7, %v1032_v4  ;;  %v3410_v6 = vld [vmem:[%s4249_s13 + $0x18] sm:$0xff]   ;;  %v3411_v7 = vld [vmem:[%s4249_s13 + $0x10] sm:$0xff]  }
 0xb5e   :  { %v3183_v9 = vpop.f32.mrf.mxu1  ;;  %v3188_v10 = vpop.f32.mrf.mxu0 }
 0xb5f   :  { %3385 = vrot.lane.b32.xlu0 %v3384_v8, %s4258_s22  ;;  %v3412_v8 = vld [vmem:[%s4249_s13 + $0x8] sm:$0xff]   ;;  %v3413_v9 = vld [vmem:[%s4249_s13] sm:$0xff]  }
 0xb60   :  { %v1083_v11 = vpop.f32.mrf.mxu0  ;;  %v2912_v10 = vld [vmem:[%s4248_s12] ss:$0 sm:$0xff] }
 0xb62   :  { %v3189_v12 = vpop.f32.mrf.mxu0 }
 0xbd1   :  { %v3386_v20 = vpop.permute.xlu0 %3385 }
 0xbd2   :  { %v3388_v26 = vunpack.i.h.bf16 %v3386_v20  ;;  %v3387_v27 = vunpack.i.l.bf16 %v3386_v20 }
 0xbd4   :  { %v1117_v34 = vsel %vm1115_vm5, %v1114_v30, %v3388_v26  ;;  %v1116_v35 = vsel %vm1115_vm5, %v1113_v29, %v3387_v27 }
 0xbd5   :  { %v1118_v36 = vpack.c.bf16 %v1117_v34, %v1116_v35 }
 0xbd7   :  { %3195 = vmatmul.mubr.msk.bf16.vlgmr.msra.gmra.mxu1 %vm64_vm0, %v1118_v36 }
 0xbd8   :  { %3214 = vmatprep.mubr.msk.bf16.mxu1 %vm3543_vm1, %v3542_v15  ;;  %3207 = vmatpush3.bf16.msra.mxu1 %v3410_v6 }
 0xbd9   :  { %3208 = vmatprep.subr.bf16.mxu1 %v3542_v15 }
 0xbdc   :  { %3209 = vmatpush3.bf16.msra.mxu1 %v3411_v7 }
 0xbdd   :  { %3210 = vmatprep.subr.bf16.mxu1 %v3542_v15 }
 0xbe0   :  { %3211 = vmatpush3.bf16.msra.mxu1 %v3412_v8  ;;  %v2923_v8 = vld [vmem:[%s4252_s16] ss:$0 sm:$0xff] }
 0xbe1   :  { %3212 = vmatprep.subr.bf16.mxu1 %v3542_v15 }
 0xbe4   :  { %3213 = vmatpush3.bf16.msra.mxu1 %v3413_v9 }
 0xbe5   :  { %3232 = vmatprep.subr.bf16.mxu1 %v3542_v15 }
 0xc97   :  { %v1179_v33 = vpop.f32.mrf.mxu1 }
 0xc98   :  { %v1180_v37 = vadd.f32 %v2906_v28, %v1179_v33 }
 0xc99   :  { %v3196_v39 = vpop.f32.mrf.mxu1 }
 0xc9a   :  { %v1186_v40 = vadd.f32 %v1180_v37, %v3679_v31 }
 0xc9b   :  { %v1182_v41 = vpop.f32.mrf.mxu1 }
 0xc9c   :  { %v1183_v43 = vadd.f32 %v2906_v28, %v1182_v41  ;;  %v1190_v44 = vsel %vm64_vm0, %v1186_v40, 0.0 }
 0xc9d   :  { %1191 = vadd.xlane.f32.xlu1 %v1190_v44  ;;  %v3197_v45 = vpop.f32.mrf.mxu1  ;;  %v2916_v44 = vld [vmem:[%s4250_s14] ss:$0 sm:$0xff] }
 0xc9e   :  { %v1187_v46 = vadd.f32 %v1183_v43, %v3681_v32  ;;  %v3408_v32 = vld [vmem:[%s4247_s11 + $0x8] sm:$0xff]  }
 0xc9f   :  { %3199 = vmatpush3.bf16.msra.mxu0 %v3408_v32 }
 0xca0   :  { %v1193_v47 = vsel %vm64_vm0, %v1187_v46, 0.0  ;;  %3200 = vmatprep.subr.bf16.mxu0 %v3542_v15 }
 0xca1   :  { %1194 = vadd.xlane.f32.xlu0 %v1193_v47 }
 0xca3   :  { %3201 = vmatpush3.bf16.msra.mxu0 %v3409_v21 }
 0xca4   :  { %3218 = vmatprep.subr.bf16.mxu0 %v3542_v15 }
 0xd26   :  { %v1192_v48 = vpop.xlane.xlu1 %1191 }
 0xd27   :  { %v1196_v54 = vmul.f32 0.03125, %v1192_v48 }
 0xd29   :  { %v1198_v49 = vsub.f32 %v1186_v40, %v1196_v54 }
 0xd2a   :  { %v1195_v50 = vpop.xlane.xlu0 %1194 }
 0xd2b   :  { %v1197_v51 = vmul.f32 0.03125, %v1195_v50  ;;  %v1200_v52 = vmul.f32 %v1198_v49, %v1198_v49 }
 0xd2d   :  { %v1199_v53 = vsub.f32 %v1187_v46, %v1197_v51  ;;  %v1202_v31 = vsel %vm64_vm0, %v1200_v52, 0.0 }
 0xd2e   :  { %1203 = vadd.xlane.f32.xlu0 %v1202_v31 }
 0xd2f   :  { %v1201_v55 = vmul.f32 %v1199_v53, %v1199_v53 }
 0xd31   :  { %v1205_v42 = vsel %vm64_vm0, %v1201_v55, 0.0 }
 0xd32   :  { %1206 = vadd.xlane.f32.xlu0 %v1205_v42 }
 0xdb7   :  { %v1204_v24 = vpop.xlane.xlu0 %1203 }
 0xdb8   :  { %v1208_v25 = vmul.f32 0.03125, %v1204_v24 }
 0xdba   :  { %v1210_v56 = vadd.f32 1e-12, %v1208_v25 }
 0xdbb   :  { %v1207_v57 = vpop.xlane.xlu0 %1206 }
 0xdbc   :  { %3460 = vrsqrt.f32 %v1210_v56  ;;  %v1209_v58 = vmul.f32 0.03125, %v1207_v57 }
 0xdbe   :  { %v1211_v59 = vadd.f32 1e-12, %v1209_v58 }
 0xdc0   :  { %3462 = vrsqrt.f32 %v1211_v59  ;;  %v3414_v59 = vld [vmem:[%s4241_s5 + $0x18] sm:$0xff]  }
 0xdc9   :  { %v3461_v60 = vpop.eup %3460 }
 0xdca   :  { %v1214_v61 = vmul.f32 %v3461_v60, %v1198_v49  ;;  %v3415_v60 = vld [vmem:[%s4241_s5 + $0x10] sm:$0xff]  }
 0xdcc   :  { %v1222_v1 = vmul.f32 %v2910_v62, %v1214_v61 }
 0xdcd   :  { %v3463_v63 = vpop.eup %3462 }
 0xdce   :  { %v1215_v0 = vmul.f32 %v3463_v63, %v1199_v53  ;;  %v1230_v3 = vadd.f32 %v2911_v38, %v1222_v1 }
 0xdd0   :  { %v1223_v2 = vmul.f32 %v2910_v62, %v1215_v0 }
 0xdd2   :  { %v1231_v4 = vadd.f32 %v2911_v38, %v1223_v2 }
 0xdd4   :  { %v1232_v5 = vpack.c.bf16 %v1231_v4, %v1230_v3 }
 0xdd6   :  { %3203 = vmatmul.mubr.msk.bf16.vlgmr.msra.gmra.mxu0 %vm64_vm0, %v1232_v5 }
 0xdd7   :  { %3222 = vmatprep.mubr.msk.bf16.mxu0 %vm3543_vm1, %v3542_v15  ;;  %3219 = vmatpush3.bf16.msra.mxu0 %v3414_v59 }
 0xdd8   :  { %3220 = vmatprep.subr.bf16.mxu0 %v3542_v15 }
 0xddb   :  { %3221 = vmatpush3.bf16.msra.mxu0 %v3415_v60 }
 0xddc   :  { %3226 = vmatprep.subr.bf16.mxu0 %v3542_v15 }
 0xe96   :  { %v1293_v11 = vpop.f32.mrf.mxu0 }
 0xe97   :  { %v1294_v12 = vadd.f32 %v2912_v10, %v1293_v11 }
 0xe98   :  { %v3204_v13 = vpop.f32.mrf.mxu0 }
 0xe99   :  { %v1302_v14 = vmul.f32 0.044715, %v1294_v12  ;;  %v1300_v33 = vmul.f32 0.5, %v1294_v12  ;;  %v2929_v13 = vld [vmem:[%s4242_s6 + $0x1] ss:$0 sm:$0xff] }
 0xe9a   :  { %v1296_v16 = vpop.f32.mrf.mxu0 }
 0xe9b   :  { %v1304_v17 = vmul.f32 %v1302_v14, %v1294_v12  ;;  %v1297_v18 = vadd.f32 %v2912_v10, %v1296_v16 }
 0xe9c   :  { %v3205_v19 = vpop.f32.mrf.mxu0 }
 0xe9d   :  { %v1306_v20 = vmul.f32 %v1304_v17, %v1294_v12  ;;  %v1303_v22 = vmul.f32 0.044715, %v1297_v18  ;;  %v1301_v37 = vmul.f32 0.5, %v1297_v18 }
 0xe9f   :  { %v1308_v23 = vadd.f32 %v1306_v20, %v1294_v12  ;;  %v1305_v26 = vmul.f32 %v1303_v22, %v1297_v18 }
 0xea1   :  { %v1310_v27 = vmul.f32 0.7978846, %v1308_v23  ;;  %v1307_v29 = vmul.f32 %v1305_v26, %v1297_v18 }
 0xea3   :  { %3464 = vtanh.f32 %v1310_v27  ;;  %v1309_v30 = vadd.f32 %v1307_v29, %v1297_v18 }
 0xea5   :  { %v1311_v34 = vmul.f32 0.7978846, %v1309_v30 }
 0xea7   :  { %3466 = vtanh.f32 %v1311_v34 }
 0xeb0   :  { %v3465_v35 = vpop.eup %3464 }
 0xeb1   :  { %v1314_v36 = vadd.f32 1.0, %v3465_v35 }
 0xeb3   :  { %v1316_v40 = vmul.f32 %v1314_v36, %v1300_v33 }
 0xeb4   :  { %v3467_v28 = vpop.eup %3466 }
 0xeb5   :  { %v1315_v39 = vadd.f32 1.0, %v3467_v28  ;;  %v3994_v28 = vld [vmem:[%s4268_s25] ss:$0 sm:$0xff] }
 0xeb7   :  { %v1317_v41 = vmul.f32 %v1315_v39, %v1301_v37 }
 0xeb9   :  { %v1318_v43 = vpack.c.bf16 %v1317_v41, %v1316_v40 }
 0xebb   :  { %3215 = vmatmul.mubr.msk.bf16.vlgmr.msra.gmra.mxu1 %vm1358_vm6, %v1318_v43 }
 0xebc   :  { %3234 = vmatprep.mubr.msk.bf16.mxu1 %vm3543_vm1, %v3542_v15 }
 0xf7b   :  { %v1396_v45 = vpop.f32.mrf.mxu1 }
 0xf7c   :  { %v1397_v46 = vadd.f32 %v2916_v44, %v1396_v45  ;;  %v4001_v45 = vld [vmem:[%s4268_s25 + $0x1] ss:$0 sm:$0xff]  ;;  %s4269_s25 = smov 72  }
 0xf7d   :  { %v3216_v47 = vpop.f32.mrf.mxu1 }
 0xf7e   :  { %v1403_v48 = vadd.f32 %v1397_v46, %v1230_v3 }
 0xf7f   :  { %v1399_v54 = vpop.f32.mrf.mxu1 }
 0xf80   :  { %v1400_v49 = vadd.f32 %v2916_v44, %v1399_v54  ;;  %v1407_v50 = vsel %vm64_vm0, %v1403_v48, 0.0 }
 0xf81   :  { %1408 = vadd.xlane.f32.xlu1 %v1407_v50  ;;  %v3217_v51 = vpop.f32.mrf.mxu1 }
 0xf82   :  { %v1404_v52 = vadd.f32 %v1400_v49, %v1231_v4  ;;  %v2922_v4 = vld [vmem:[%s4251_s15] ss:$0 sm:$0xff] }
 0xf84   :  { %v1410_v53 = vsel %vm64_vm0, %v1404_v52, 0.0 }
 0xf85   :  { %1411 = vadd.xlane.f32.xlu0 %v1410_v53 }
0x100a   :  { %v1409_v31 = vpop.xlane.xlu1 %1408 }
0x100b   :  { %v1413_v55 = vmul.f32 0.03125, %v1409_v31 }
0x100d   :  { %v1415_v42 = vsub.f32 %v1403_v48, %v1413_v55 }
0x100e   :  { %v1412_v32 = vpop.xlane.xlu0 %1411 }
0x100f   :  { %v1414_v21 = vmul.f32 0.03125, %v1412_v32  ;;  %v1417_v24 = vmul.f32 %v1415_v42, %v1415_v42 }
0x1011   :  { %v1416_v25 = vsub.f32 %v1404_v52, %v1414_v21  ;;  %v1419_v56 = vsel %vm64_vm0, %v1417_v24, 0.0 }
0x1012   :  { %1420 = vadd.xlane.f32.xlu1 %v1419_v56 }
0x1013   :  { %v1418_v57 = vmul.f32 %v1416_v25, %v1416_v25 }
0x1015   :  { %v1422_v58 = vsel %vm64_vm0, %v1418_v57, 0.0 }
0x1016   :  { %1423 = vadd.xlane.f32.xlu0 %v1422_v58 }
0x109b   :  { %v1421_v61 = vpop.xlane.xlu1 %1420 }
0x109c   :  { %v1425_v62 = vmul.f32 0.03125, %v1421_v61 }
0x109e   :  { %v1427_v63 = vadd.f32 1e-12, %v1425_v62 }
0x109f   :  { %v1424_v0 = vpop.xlane.xlu0 %1423 }
0x10a0   :  { %3468 = vrsqrt.f32 %v1427_v63  ;;  %v1426_v1 = vmul.f32 0.03125, %v1424_v0 }
0x10a2   :  { %v1428_v38 = vadd.f32 1e-12, %v1426_v1 }
0x10a4   :  { %3470 = vrsqrt.f32 %v1428_v38 }
0x10ad   :  { %v3469_v2 = vpop.eup %3468 }
0x10ae   :  { %v1431_v3 = vmul.f32 %v3469_v2, %v1415_v42 }
0x10b0   :  { %v1439_v7 = vmul.f32 %v2922_v4, %v1431_v3 }
0x10b1   :  { %v3471_v5 = vpop.eup %3470 }
0x10b2   :  { %v1432_v6 = vmul.f32 %v3471_v5, %v1416_v25  ;;  %v3959_v10 = vadd.f32 %v2923_v8, %v1439_v7 }
0x10b4   :  { %v1440_v9 = vmul.f32 %v2922_v4, %v1432_v6 }
0x10b6   :  { %v3961_v11 = vadd.f32 %v2923_v8, %v1440_v9 }
0x10b8   :  { %v1449_v12 = vpack.c.bf16 %v3961_v11, %v3959_v10 }
0x10ba   :  { %3223 = vmatmul.mubr.msk.bf16.vlgmr.msra.gmra.mxu0 %vm64_vm0, %v1449_v12 }
0x10bb   :  { %3228 = vmatprep.mubr.msk.bf16.mxu0 %vm3543_vm1, %v3542_v15 }
0x117a   :  { %v1512_v14 = vpop.f32.mrf.mxu0 }
0x117b   :  { %v1513_v16 = vadd.f32 %v2929_v13, %v1512_v14 }
0x117c   :  { %v3224_v17 = vpop.f32.mrf.mxu0 }
0x117d   :  { %v3971_v18 = vpack.c.bf16 %v1513_v16, %v1513_v16 }
0x117e   :  { %v1515_v19 = vpop.f32.mrf.mxu0 }
0x117f   :  { %v1516_v20 = vadd.f32 %v2929_v13, %v1515_v19  ;;  %1522 = vrot.lane.b32.xlu1 %v3971_v18, %s3544_s4 }
0x1180   :  { %v3225_v22 = vpop.f32.mrf.mxu0 }
0x1181   :  { %v3975_v23 = vpack.c.bf16 %v1516_v20, %v1516_v20 }
0x1183   :  { %1571 = vrot.lane.b32.xlu0 %v3975_v23, %s3544_s4 }
0x11f1   :  { %v1523_v26 = vpop.permute.xlu1 %1522 }
0x11f2   :  { %v1528_v27 = vsel %vm181_vm2, %v1523_v26, 0 }
0x11f3   :  { %3227 = vmatpush3.bf16.xpose.msra.mxu0 %v1528_v27 }
0x11f4   :  { %3238 = vmatprep.subr.bf16.mxu0 %v3542_v15 }
0x11f5   :  { %v1572_v29 = vpop.permute.xlu0 %1571 }
0x11f6   :  { %v1577_v30 = vsel %vm181_vm2, %v1572_v29, 0 }
0x11f7   :  { %3233 = vmatpush3.bf16.xpose.msra.mxu1 %v1577_v30 }
0x11f8   :  { %3244 = vmatprep.subr.bf16.mxu1 %v3542_v15 }
0x11fa   :  { %3229 = vmatmul.mubr.msk.bf16.vlgmr.msra.gmra.mxu0 %vm181_vm2, %v3971_v18 }
0x11fb   :  { %3240 = vmatprep.mubr.msk.bf16.mxu0 %vm3543_vm1, %v3542_v15 }
0x11fe   :  { %3235 = vmatmul.mubr.msk.bf16.vlgmr.msra.gmra.mxu1 %vm181_vm2, %v3975_v23 }
0x11ff   :  { %3246 = vmatprep.mubr.msk.bf16.mxu1 %vm3543_vm1, %v3542_v15 }
0x12ba   :  { %v1564_v34 = vpop.f32.mrf.mxu0 }
0x12bb   :  { %v1619_v35 = vmul.f32 0.35355338, %v1564_v34 }
0x12bc   :  { %v3230_v36 = vpop.f32.mrf.mxu0 }
0x12bd   :  { %v1621_v33 = vadd.f32 %v3994_v28, %v1619_v35 }
0x12be   :  { %v1567_v37 = vpop.f32.mrf.mxu0  ;;  %v1613_v39 = vpop.f32.mrf.mxu1 }
0x12bf   :  { %v1620_v40 = vmul.f32 0.35355338, %v1613_v39  ;;  %v1623_v41 = vsel %vm181_vm2, %v1621_v33, -inf }
0x12c0   :  { %v3236_v43 = vpop.f32.mrf.mxu1  ;;  %1624 = vmax.xlane.f32.xlu1 %v1623_v41  ;;  %v3231_v44 = vpop.f32.mrf.mxu0 }
0x12c1   :  { %v1622_v46 = vadd.f32 %v4001_v45, %v1620_v40 }
0x12c2   :  { %v1616_v47 = vpop.f32.mrf.mxu1 }
0x12c3   :  { %v1626_v48 = vsel %vm181_vm2, %v1622_v46, -inf }
0x12c4   :  { %1627 = vmax.xlane.f32.xlu0 %v1626_v48  ;;  %v3237_v54 = vpop.f32.mrf.mxu1 }
0x12d1   :  { %1647 = vrot.lane.b32.xlu1 %v3971_v18, %s3545_s28 }
0x1349   :  { %v1625_v49 = vpop.xlane.xlu1 %1624 }
0x134a   :  { %v1629_v50 = vsub.f32 %v1621_v33, %v1625_v49 }
0x134c   :  { %v1631_v51 = vmul.f32 1.442695, %v1629_v50 }
0x134d   :  { %v1628_v52 = vpop.xlane.xlu0 %1627  ;;  %v1648_v53 = vpop.permute.xlu1 %1647 }
0x134e   :  { %3472 = vpow2.f32 %v1631_v51  ;;  %v1630_v31 = vsub.f32 %v1622_v46, %v1628_v52  ;;  %v1653_v55 = vsel %vm322_vm3, %v1648_v53, 0 }
0x134f   :  { %3239 = vmatpush3.bf16.msra.mxu0 %v1653_v55 }
0x1350   :  { %v1633_v42 = vmul.f32 1.442695, %v1630_v31  ;;  %3250 = vmatprep.subr.bf16.mxu0 %v3542_v15 }
0x1352   :  { %3474 = vpow2.f32 %v1633_v42 }
0x135b   :  { %v3473_v32 = vpop.eup %3472 }
0x135c   :  { %v1635_v21 = vsel %vm181_vm2, %v3473_v32, 0.0 }
0x135d   :  { %1636 = vadd.xlane.f32.xlu1 %v1635_v21 }
0x135f   :  { %v3475_v24 = vpop.eup %3474 }
0x1360   :  { %v1638_v25 = vsel %vm181_vm2, %v3475_v24, 0.0 }
0x1361   :  { %1639 = vadd.xlane.f32.xlu0 %v1638_v25 }
0x136e   :  { %1745 = vrot.lane.b32.xlu1 %v3971_v18, %s3546_s29 }
0x1372   :  { %1795 = vrot.lane.b32.xlu1 %v3975_v23, %s3546_s29  ;;  %s4271_s29 = smov 40  }
0x1376   :  { %1743 = vrot.lane.b32.xlu1 %v3971_v18, %s3547_s0 }
0x1377   :  { %1695 = vrot.lane.b32.xlu0 %v3975_v23, %s3545_s28  ;;  %s4270_s28 = smov 104  }
0x137b   :  { %1793 = vrot.lane.b32.xlu0 %v3975_v23, %s3547_s0  ;;  %s4272_s0 = smov 8  }
0x13e6   :  { %v1637_v56 = vpop.xlane.xlu1 %1636 }
0x13e7   :  { %3476 = vrcp.f32 %v1637_v56 }
0x13ea   :  { %v1640_v57 = vpop.xlane.xlu0 %1639  ;;  %v1746_v61 = vpop.permute.xlu1 %1745 }
0x13eb   :  { %3478 = vrcp.f32 %v1640_v57  ;;  %v1751_v1 = vsel %vm181_vm2, %v1746_v61, 0 }
0x13ee   :  { %v1696_v58 = vpop.permute.xlu0 %1695  ;;  %v1796_v2 = vpop.permute.xlu1 %1795 }
0x13ef   :  { %v1701_v59 = vsel %vm322_vm3, %v1696_v58, 0  ;;  %v1801_v4 = vsel %vm181_vm2, %v1796_v2, 0 }
0x13f0   :  { %3245 = vmatpush3.bf16.msra.mxu1 %v1701_v59 }
0x13f1   :  { %3256 = vmatprep.subr.bf16.mxu1 %v3542_v15 }
0x13f2   :  { %v1744_v5 = vpop.permute.xlu1 %1743  ;;  %v1794_v6 = vpop.permute.xlu0 %1793 }
0x13f4   :  { %v3477_v60 = vpop.eup %3476 }
0x13f5   :  { %v1643_v62 = vmul.f32 %v3477_v60, %v3473_v32 }
0x13f7   :  { %v1645_v63 = vpack.c.bf16 %v1643_v62, %v1643_v62 }
0x13f8   :  { %v3479_v0 = vpop.eup %3478 }
0x13f9   :  { %3241 = vmatmul.mubr.msk.bf16.vlgmr.msra.gmra.mxu0 %vm181_vm2, %v1645_v63  ;;  %v1644_v38 = vmul.f32 %v3479_v0, %v3475_v24 }
0x13fa   :  { %3251 = vmatpush3.bf16.xpose.msra.mxu0 %v1751_v1  ;;  %3252 = vmatprep.mubr.msk.bf16.mxu0 %vm3543_vm1, %v3542_v15 }
0x13fb   :  { %v1646_v3 = vpack.c.bf16 %v1644_v38, %v1644_v38  ;;  %3262 = vmatprep.subr.bf16.mxu0 %v3542_v15 }
0x13fd   :  { %3247 = vmatmul.mubr.msk.bf16.vlgmr.msra.gmra.mxu1 %vm181_vm2, %v1646_v3 }
0x13fe   :  { %3257 = vmatpush3.bf16.xpose.msra.mxu1 %v1801_v4  ;;  %3258 = vmatprep.mubr.msk.bf16.mxu1 %vm3543_vm1, %v3542_v15 }
0x13ff   :  { %3268 = vmatprep.subr.bf16.mxu1 %v3542_v15 }
0x1401   :  { %3253 = vmatmul.mubr.msk.bf16.vlgmr.msra.gmra.mxu0 %vm181_vm2, %v1744_v5 }
0x1402   :  { %3264 = vmatprep.mubr.msk.bf16.mxu0 %vm3543_vm1, %v3542_v15 }
0x1405   :  { %3259 = vmatmul.mubr.msk.bf16.vlgmr.msra.gmra.mxu1 %vm181_vm2, %v1794_v6 }
0x1406   :  { %3270 = vmatprep.mubr.msk.bf16.mxu1 %vm3543_vm1, %v3542_v15 }
0x14b9   :  { %v4039_v7 = vpop.f32.mrf.mxu0 }
0x14bb   :  { %v3242_v8 = vpop.f32.mrf.mxu0 }
0x14bd   :  { %v1692_v9 = vpop.f32.mrf.mxu0  ;;  %v4041_v12 = vpop.f32.mrf.mxu1 }
0x14bf   :  { %v3243_v13 = vpop.f32.mrf.mxu0  ;;  %v3248_v14 = vpop.f32.mrf.mxu1 }
0x14c1   :  { %v1740_v16 = vpop.f32.mrf.mxu1  ;;  %v1787_v17 = vpop.f32.mrf.mxu0 }
0x14c2   :  { %v1843_v19 = vmul.f32 0.35355338, %v1787_v17 }
0x14c3   :  { %v3249_v20 = vpop.f32.mrf.mxu1  ;;  %v3254_v22 = vpop.f32.mrf.mxu0 }
0x14c4   :  { %v1845_v26 = vadd.f32 %v3994_v28, %v1843_v19 }
0x14c5   :  { %v1790_v27 = vpop.f32.mrf.mxu0  ;;  %v1837_v29 = vpop.f32.mrf.mxu1 }
0x14c6   :  { %v1844_v30 = vmul.f32 0.35355338, %v1837_v29  ;;  %v1847_v34 = vsel %vm181_vm2, %v1845_v26, -inf }
0x14c7   :  { %v3260_v35 = vpop.f32.mrf.mxu1  ;;  %1848 = vmax.xlane.f32.xlu1 %v1847_v34  ;;  %v3255_v36 = vpop.f32.mrf.mxu0 }
0x14c8   :  { %v1846_v33 = vadd.f32 %v4001_v45, %v1844_v30 }
0x14c9   :  { %v1840_v37 = vpop.f32.mrf.mxu1 }
0x14ca   :  { %v1850_v39 = vsel %vm181_vm2, %v1846_v33, -inf }
0x14cb   :  { %1851 = vmax.xlane.f32.xlu0 %v1850_v39  ;;  %v3261_v40 = vpop.f32.mrf.mxu1 }
0x14d8   :  { %1871 = vrot.lane.b32.xlu1 %v3971_v18, %s3548_s30 }
0x14dc   :  { %1969 = vrot.lane.b32.xlu1 %v3971_v18, %s3549_s18 }
0x14e0   :  { %2019 = vrot.lane.b32.xlu1 %v3975_v23, %s3549_s18 }
0x14e4   :  { %1967 = vrot.lane.b32.xlu1 %v3971_v18, %s3550_s19 }
0x1550   :  { %v1849_v41 = vpop.xlane.xlu1 %1848 }
0x1551   :  { %v1853_v43 = vsub.f32 %v1845_v26, %v1849_v41 }
0x1553   :  { %v1855_v44 = vmul.f32 1.442695, %v1853_v43 }
0x1554   :  { %v1852_v46 = vpop.xlane.xlu0 %1851  ;;  %v1872_v47 = vpop.permute.xlu1 %1871 }
0x1555   :  { %3480 = vpow2.f32 %v1855_v44  ;;  %v1854_v48 = vsub.f32 %v1846_v33, %v1852_v46  ;;  %v1877_v54 = vsel %vm322_vm3, %v1872_v47, 0 }
0x1556   :  { %3263 = vmatpush3.bf16.msra.mxu0 %v1877_v54 }
0x1557   :  { %v1857_v49 = vmul.f32 1.442695, %v1854_v48  ;;  %3274 = vmatprep.subr.bf16.mxu0 %v3542_v15 }
0x1558   :  { %v1970_v24 = vpop.permute.xlu1 %1969 }
0x1559   :  { %3482 = vpow2.f32 %v1857_v49  ;;  %v1975_v58 = vsel %vm181_vm2, %v1970_v24, 0 }
0x155c   :  { %v2020_v60 = vpop.permute.xlu1 %2019 }
0x155d   :  { %v2025_v62 = vsel %vm181_vm2, %v2020_v60, 0 }
0x1560   :  { %v1968_v63 = vpop.permute.xlu1 %1967 }
0x1562   :  { %v3481_v50 = vpop.eup %3480 }
0x1563   :  { %v1859_v51 = vsel %vm181_vm2, %v3481_v50, 0.0 }
0x1564   :  { %1860 = vadd.xlane.f32.xlu0 %v1859_v51 }
0x1566   :  { %v3483_v52 = vpop.eup %3482 }
0x1567   :  { %v1862_v53 = vsel %vm181_vm2, %v3483_v52, 0.0 }
0x1568   :  { %1863 = vadd.xlane.f32.xlu0 %v1862_v53 }
0x157e   :  { %1919 = vrot.lane.b32.xlu0 %v3975_v23, %s3548_s30  ;;  %s4273_s30 = smov 16  }
0x1582   :  { %2017 = vrot.lane.b32.xlu0 %v3975_v23, %s3550_s19 }
0x15ed   :  { %v1861_v31 = vpop.xlane.xlu0 %1860 }
0x15ee   :  { %3484 = vrcp.f32 %v1861_v31 }
0x15f1   :  { %v1864_v55 = vpop.xlane.xlu0 %1863 }
0x15f2   :  { %3486 = vrcp.f32 %v1864_v55 }
0x15f5   :  { %v1920_v42 = vpop.permute.xlu0 %1919 }
0x15f6   :  { %v1925_v32 = vsel %vm322_vm3, %v1920_v42, 0 }
0x15f7   :  { %3269 = vmatpush3.bf16.msra.mxu1 %v1925_v32 }
0x15f8   :  { %3280 = vmatprep.subr.bf16.mxu1 %v3542_v15 }
0x15f9   :  { %v2018_v0 = vpop.permute.xlu0 %2017 }
0x15fb   :  { %v3485_v21 = vpop.eup %3484 }
0x15fc   :  { %v1867_v25 = vmul.f32 %v3485_v21, %v3481_v50 }
0x15fe   :  { %v1869_v56 = vpack.c.bf16 %v1867_v25, %v1867_v25 }
0x15ff   :  { %v3487_v57 = vpop.eup %3486 }
0x1600   :  { %3265 = vmatmul.mubr.msk.bf16.vlgmr.msra.gmra.mxu0 %vm181_vm2, %v1869_v56  ;;  %v1868_v59 = vmul.f32 %v3487_v57, %v3483_v52 }
0x1601   :  { %3275 = vmatpush3.bf16.xpose.msra.mxu0 %v1975_v58  ;;  %3276 = vmatprep.mubr.msk.bf16.mxu0 %vm3543_vm1, %v3542_v15 }
0x1602   :  { %v1870_v61 = vpack.c.bf16 %v1868_v59, %v1868_v59  ;;  %3286 = vmatprep.subr.bf16.mxu0 %v3542_v15 }
0x1604   :  { %3271 = vmatmul.mubr.msk.bf16.vlgmr.msra.gmra.mxu1 %vm181_vm2, %v1870_v61 }
0x1605   :  { %3281 = vmatpush3.bf16.xpose.msra.mxu1 %v2025_v62  ;;  %3282 = vmatprep.mubr.msk.bf16.mxu1 %vm3543_vm1, %v3542_v15 }
0x1606   :  { %3292 = vmatprep.subr.bf16.mxu1 %v3542_v15 }
0x1608   :  { %3277 = vmatmul.mubr.msk.bf16.vlgmr.msra.gmra.mxu0 %vm181_vm2, %v1968_v63 }
0x1609   :  { %3288 = vmatprep.mubr.msk.bf16.mxu0 %vm3543_vm1, %v3542_v15 }
0x160c   :  { %3283 = vmatmul.mubr.msk.bf16.vlgmr.msra.gmra.mxu1 %vm181_vm2, %v2018_v0 }
0x160d   :  { %3294 = vmatprep.mubr.msk.bf16.mxu1 %vm3543_vm1, %v3542_v15 }
0x16c0   :  { %v4081_v1 = vpop.f32.mrf.mxu0 }
0x16c2   :  { %v3266_v38 = vpop.f32.mrf.mxu0 }
0x16c4   :  { %v1916_v2 = vpop.f32.mrf.mxu0  ;;  %v4083_v3 = vpop.f32.mrf.mxu1 }
0x16c5   :  { %v3389_v4 = vpack.i.bf16 %v4083_v3, %v4081_v1 }
0x16c6   :  { %v3267_v5 = vpop.f32.mrf.mxu0  ;;  %v3272_v6 = vpop.f32.mrf.mxu1 }
0x16c8   :  { %v1964_v8 = vpop.f32.mrf.mxu1  ;;  %v2011_v9 = vpop.f32.mrf.mxu0 }
0x16c9   :  { %v2067_v13 = vmul.f32 0.35355338, %v2011_v9 }
0x16ca   :  { %v3273_v14 = vpop.f32.mrf.mxu1  ;;  %v3278_v16 = vpop.f32.mrf.mxu0 }
0x16cb   :  { %v2069_v17 = vadd.f32 %v3994_v28, %v2067_v13 }
0x16cc   :  { %v2014_v19 = vpop.f32.mrf.mxu0  ;;  %v2061_v20 = vpop.f32.mrf.mxu1 }
0x16cd   :  { %v2068_v22 = vmul.f32 0.35355338, %v2061_v20  ;;  %v2071_v26 = vsel %vm181_vm2, %v2069_v17, -inf }
0x16ce   :  { %v3284_v27 = vpop.f32.mrf.mxu1  ;;  %2072 = vmax.xlane.f32.xlu1 %v2071_v26  ;;  %v3279_v29 = vpop.f32.mrf.mxu0 }
0x16cf   :  { %v2070_v30 = vadd.f32 %v4001_v45, %v2068_v22 }
0x16d0   :  { %v2064_v34 = vpop.f32.mrf.mxu1 }
0x16d1   :  { %v2074_v35 = vsel %vm181_vm2, %v2070_v30, -inf }
0x16d2   :  { %2075 = vmax.xlane.f32.xlu0 %v2074_v35  ;;  %v3285_v36 = vpop.f32.mrf.mxu1 }
0x16df   :  { %2095 = vrot.lane.b32.xlu1 %v3971_v18, %s3551_s1 }
0x16e3   :  { %2193 = vrot.lane.b32.xlu1 %v3971_v18, %s4269_s25 }
0x16e7   :  { %2243 = vrot.lane.b32.xlu1 %v3975_v23, %s4269_s25 }
0x16eb   :  { %2191 = vrot.lane.b32.xlu1 %v3971_v18, %s4270_s28 }
0x1757   :  { %v2073_v33 = vpop.xlane.xlu1 %2072 }
0x1758   :  { %v2077_v37 = vsub.f32 %v2069_v17, %v2073_v33 }
0x175a   :  { %v2079_v39 = vmul.f32 1.442695, %v2077_v37 }
0x175b   :  { %v2076_v40 = vpop.xlane.xlu0 %2075  ;;  %v2096_v41 = vpop.permute.xlu1 %2095 }
0x175c   :  { %3488 = vpow2.f32 %v2079_v39  ;;  %v2078_v43 = vsub.f32 %v2070_v30, %v2076_v40  ;;  %v2101_v44 = vsel %vm322_vm3, %v2096_v41, 0 }
0x175d   :  { %3287 = vmatpush3.bf16.msra.mxu0 %v2101_v44 }
0x175e   :  { %v2081_v46 = vmul.f32 1.442695, %v2078_v43  ;;  %3298 = vmatprep.subr.bf16.mxu0 %v3542_v15 }
0x175f   :  { %v2194_v55 = vpop.permute.xlu1 %2193 }
0x1760   :  { %3490 = vpow2.f32 %v2081_v46  ;;  %v2199_v24 = vsel %vm181_vm2, %v2194_v55, 0 }
0x1763   :  { %v2244_v56 = vpop.permute.xlu1 %2243 }
0x1764   :  { %v2249_v58 = vsel %vm181_vm2, %v2244_v56, 0 }
0x1767   :  { %v2192_v59 = vpop.permute.xlu1 %2191 }
0x1769   :  { %v3489_v47 = vpop.eup %3488 }
0x176a   :  { %v2083_v48 = vsel %vm181_vm2, %v3489_v47, 0.0 }
0x176b   :  { %2084 = vadd.xlane.f32.xlu0 %v2083_v48 }
0x176d   :  { %v3491_v54 = vpop.eup %3490 }
0x176e   :  { %v2086_v49 = vsel %vm181_vm2, %v3491_v54, 0.0 }
0x176f   :  { %2087 = vadd.xlane.f32.xlu0 %v2086_v49 }
0x1785   :  { %2143 = vrot.lane.b32.xlu0 %v3975_v23, %s3551_s1 }
0x1789   :  { %2241 = vrot.lane.b32.xlu0 %v3975_v23, %s4270_s28 }
0x17f4   :  { %v2085_v50 = vpop.xlane.xlu0 %2084 }
0x17f5   :  { %3492 = vrcp.f32 %v2085_v50 }
0x17f8   :  { %v2088_v51 = vpop.xlane.xlu0 %2087 }
0x17f9   :  { %3494 = vrcp.f32 %v2088_v51 }
0x17fc   :  { %v2144_v52 = vpop.permute.xlu0 %2143 }
0x17fd   :  { %v2149_v53 = vsel %vm322_vm3, %v2144_v52, 0  ;;  %v3416_v52 = vld [vmem:[%s4243_s7 + $0x18] sm:$0xff]  }
0x17fe   :  { %3293 = vmatpush3.bf16.msra.mxu1 %v2149_v53  ;;  %v3417_v53 = vld [vmem:[%s4243_s7 + $0x10] sm:$0xff]  }
0x17ff   :  { %3304 = vmatprep.subr.bf16.mxu1 %v3542_v15 }
0x1800   :  { %v2242_v60 = vpop.permute.xlu0 %2241 }
0x1802   :  { %v3493_v31 = vpop.eup %3492 }
0x1803   :  { %v2091_v42 = vmul.f32 %v3493_v31, %v3489_v47 }
0x1805   :  { %v2093_v32 = vpack.c.bf16 %v2091_v42, %v2091_v42 }
0x1806   :  { %v3495_v21 = vpop.eup %3494 }
0x1807   :  { %3289 = vmatmul.mubr.msk.bf16.vlgmr.msra.gmra.mxu0 %vm181_vm2, %v2093_v32  ;;  %v2092_v25 = vmul.f32 %v3495_v21, %v3491_v54 }
0x1808   :  { %3299 = vmatpush3.bf16.xpose.msra.mxu0 %v2199_v24  ;;  %3300 = vmatprep.mubr.msk.bf16.mxu0 %vm3543_vm1, %v3542_v15 }
0x1809   :  { %v2094_v57 = vpack.c.bf16 %v2092_v25, %v2092_v25  ;;  %3310 = vmatprep.subr.bf16.mxu0 %v3542_v15 }
0x180b   :  { %3295 = vmatmul.mubr.msk.bf16.vlgmr.msra.gmra.mxu1 %vm181_vm2, %v2094_v57 }
0x180c   :  { %3305 = vmatpush3.bf16.xpose.msra.mxu1 %v2249_v58  ;;  %3306 = vmatprep.mubr.msk.bf16.mxu1 %vm3543_vm1, %v3542_v15 }
0x180d   :  { %3316 = vmatprep.subr.bf16.mxu1 %v3542_v15 }
0x180f   :  { %3301 = vmatmul.mubr.msk.bf16.vlgmr.msra.gmra.mxu0 %vm181_vm2, %v2192_v59 }
0x1810   :  { %3312 = vmatprep.mubr.msk.bf16.mxu0 %vm3543_vm1, %v3542_v15 }
0x1813   :  { %3307 = vmatmul.mubr.msk.bf16.vlgmr.msra.gmra.mxu1 %vm181_vm2, %v2242_v60 }
0x1814   :  { %3318 = vmatprep.mubr.msk.bf16.mxu1 %vm3543_vm1, %v3542_v15 }
0x18c7   :  { %v2137_v61 = vpop.f32.mrf.mxu0 }
0x18c9   :  { %v3290_v62 = vpop.f32.mrf.mxu0 }
0x18cb   :  { %v2140_v63 = vpop.f32.mrf.mxu0  ;;  %v2185_v0 = vpop.f32.mrf.mxu1 }
0x18cd   :  { %v3291_v38 = vpop.f32.mrf.mxu0  ;;  %v3296_v2 = vpop.f32.mrf.mxu1 }
0x18cf   :  { %v2188_v5 = vpop.f32.mrf.mxu1  ;;  %v2235_v6 = vpop.f32.mrf.mxu0 }
0x18d0   :  { %v2291_v8 = vmul.f32 0.35355338, %v2235_v6 }
0x18d1   :  { %v3297_v9 = vpop.f32.mrf.mxu1  ;;  %v3302_v13 = vpop.f32.mrf.mxu0 }
0x18d2   :  { %v2293_v14 = vadd.f32 %v3994_v28, %v2291_v8  ;;  %v3394_v28 = vpack.i.bf16 %v2185_v0, %v2137_v61 }
0x18d3   :  { %v2238_v16 = vpop.f32.mrf.mxu0  ;;  %v2285_v17 = vpop.f32.mrf.mxu1 }
0x18d4   :  { %v2292_v19 = vmul.f32 0.35355338, %v2285_v17  ;;  %v2295_v20 = vsel %vm181_vm2, %v2293_v14, -inf }
0x18d5   :  { %v3308_v22 = vpop.f32.mrf.mxu1  ;;  %2296 = vmax.xlane.f32.xlu1 %v2295_v20  ;;  %v3303_v26 = vpop.f32.mrf.mxu0 }
0x18d6   :  { %v2294_v27 = vadd.f32 %v4001_v45, %v2292_v19 }
0x18d7   :  { %v2288_v29 = vpop.f32.mrf.mxu1 }
0x18d8   :  { %v2298_v30 = vsel %vm181_vm2, %v2294_v27, -inf }
0x18d9   :  { %2299 = vmax.xlane.f32.xlu0 %v2298_v30  ;;  %v3309_v34 = vpop.f32.mrf.mxu1 }
0x18e6   :  { %2319 = vrot.lane.b32.xlu1 %v3971_v18, %s4271_s29 }
0x18ea   :  { %3390 = vrot.lane.b32.xlu1 %v3389_v4, %s4272_s0 }
0x18ee   :  { %3395 = vrot.lane.b32.xlu1 %v3394_v28, %s4273_s30 }
0x195e   :  { %v2297_v35 = vpop.xlane.xlu1 %2296 }
0x195f   :  { %v2301_v36 = vsub.f32 %v2293_v14, %v2297_v35 }
0x1961   :  { %v2303_v33 = vmul.f32 1.442695, %v2301_v36 }
0x1962   :  { %v2300_v45 = vpop.xlane.xlu0 %2299  ;;  %v2320_v37 = vpop.permute.xlu1 %2319 }
0x1963   :  { %3496 = vpow2.f32 %v2303_v33  ;;  %v2302_v39 = vsub.f32 %v2294_v27, %v2300_v45  ;;  %v2325_v40 = vsel %vm322_vm3, %v2320_v37, 0 }
0x1964   :  { %3311 = vmatpush3.bf16.msra.mxu0 %v2325_v40 }
0x1965   :  { %v2305_v41 = vmul.f32 1.442695, %v2302_v39  ;;  %3322 = vmatprep.subr.bf16.mxu0 %v3542_v15 }
0x1966   :  { %v3391_v58 = vpop.permute.xlu1 %3390 }
0x1967   :  { %3498 = vpow2.f32 %v2305_v41  ;;  %v3393_v60 = vunpack.i.h.bf16 %v3391_v58  ;;  %v3392_v61 = vunpack.i.l.bf16 %v3391_v58 }
0x1969   :  { %v2440_v38 = vsel %vm181_vm2, %v4041_v12, %v3393_v60  ;;  %v2439_v2 = vsel %vm181_vm2, %v4039_v7, %v3392_v61  ;;  %v2954_v7 = vld [vmem:[%s4244_s8 + $0x1] ss:$0 sm:$0xff] }
0x196a   :  { %v3396_v59 = vpop.permute.xlu1 %3395 }
0x196b   :  { %v3398_v62 = vunpack.i.h.bf16 %v3396_v59  ;;  %v3397_v63 = vunpack.i.l.bf16 %v3396_v59 }
0x196d   :  { %v2441_v8 = vsel %vm1112_vm4, %v2439_v2, %v3397_v63  ;;  %v2442_v9 = vsel %vm1112_vm4, %v2440_v38, %v3398_v62 }
0x1970   :  { %v3497_v18 = vpop.eup %3496 }
0x1971   :  { %v2307_v1 = vsel %vm181_vm2, %v3497_v18, 0.0 }
0x1972   :  { %2308 = vadd.xlane.f32.xlu0 %v2307_v1 }
0x1974   :  { %v3499_v3 = vpop.eup %3498 }
0x1975   :  { %v2310_v4 = vsel %vm181_vm2, %v3499_v3, 0.0 }
0x1976   :  { %2311 = vadd.xlane.f32.xlu0 %v2310_v4 }
0x198c   :  { %2367 = vrot.lane.b32.xlu0 %v3975_v23, %s4271_s29 }
0x19fb   :  { %v2309_v43 = vpop.xlane.xlu0 %2308 }
0x19fc   :  { %3500 = vrcp.f32 %v2309_v43 }
0x19ff   :  { %v2312_v44 = vpop.xlane.xlu0 %2311 }
0x1a00   :  { %3502 = vrcp.f32 %v2312_v44 }
0x1a03   :  { %v2368_v46 = vpop.permute.xlu0 %2367 }
0x1a04   :  { %v2373_v47 = vsel %vm322_vm3, %v2368_v46, 0 }
0x1a05   :  { %3317 = vmatpush3.bf16.msra.mxu1 %v2373_v47 }
0x1a06   :  { %3330 = vmatprep.subr.bf16.mxu1 %v3542_v15 }
0x1a09   :  { %v3501_v48 = vpop.eup %3500 }
0x1a0a   :  { %v2315_v54 = vmul.f32 %v3501_v48, %v3497_v18  ;;  %v3419_v18 = vld [vmem:[%s4247_s11 + $0x10] sm:$0xff]  }
0x1a0c   :  { %v2317_v49 = vpack.c.bf16 %v2315_v54, %v2315_v54  ;;  %v2960_v54 = vld [vmem:[%s4245_s9 + $0x1] ss:$0 sm:$0xff] }
0x1a0d   :  { %v3503_v50 = vpop.eup %3502 }
0x1a0e   :  { %3313 = vmatmul.mubr.msk.bf16.vlgmr.msra.gmra.mxu0 %vm181_vm2, %v2317_v49  ;;  %v2316_v51 = vmul.f32 %v3503_v50, %v3499_v3 }
0x1a0f   :  { %3326 = vmatprep.mubr.msk.bf16.mxu0 %vm3543_vm1, %v3542_v15  ;;  %3323 = vmatpush3.bf16.msra.mxu0 %v3416_v52 }
0x1a10   :  { %v2318_v23 = vpack.c.bf16 %v2316_v51, %v2316_v51  ;;  %3324 = vmatprep.subr.bf16.mxu0 %v3542_v15 }
0x1a12   :  { %3319 = vmatmul.mubr.msk.bf16.vlgmr.msra.gmra.mxu1 %vm181_vm2, %v2318_v23  ;;  %v2961_v23 = vld [vmem:[%s4246_s10 + $0x1] ss:$0 sm:$0xff] }
0x1a13   :  { %3334 = vmatprep.mubr.msk.bf16.mxu1 %vm3543_vm1, %v3542_v15  ;;  %3325 = vmatpush3.bf16.msra.mxu0 %v3417_v53 }
0x1a14   :  { %3338 = vmatprep.subr.bf16.mxu0 %v3542_v15 }
0x1ace   :  { %v2361_v31 = vpop.f32.mrf.mxu0 }
0x1ad0   :  { %v3314_v55 = vpop.f32.mrf.mxu0 }
0x1ad2   :  { %v2364_v42 = vpop.f32.mrf.mxu0  ;;  %v2409_v32 = vpop.f32.mrf.mxu1 }
0x1ad3   :  { %v3399_v21 = vpack.i.bf16 %v2409_v32, %v2361_v31  ;;  %v3420_v42 = vld [vmem:[%s4249_s13 + $0x38] sm:$0xff]   ;;  %v3421_v32 = vld [vmem:[%s4249_s13 + $0x30] sm:$0xff]  }
0x1ad4   :  { %v3315_v24 = vpop.f32.mrf.mxu0  ;;  %v3320_v25 = vpop.f32.mrf.mxu1 }
0x1ad5   :  { %3400 = vrot.lane.b32.xlu1 %v3399_v21, %s4274_s3  ;;  %v3422_v21 = vld [vmem:[%s4249_s13 + $0x28] sm:$0xff]   ;;  %v3423_v24 = vld [vmem:[%s4249_s13 + $0x20] sm:$0xff]  }
0x1ad6   :  { %v2412_v56 = vpop.f32.mrf.mxu1  ;;  %v2967_v25 = vld [vmem:[%s4248_s12 + $0x1] ss:$0 sm:$0xff] }
0x1ad8   :  { %v3321_v57 = vpop.f32.mrf.mxu1 }
0x1b47   :  { %v3401_v0 = vpop.permute.xlu1 %3400 }
0x1b48   :  { %v3403_v5 = vunpack.i.h.bf16 %v3401_v0  ;;  %v3402_v6 = vunpack.i.l.bf16 %v3401_v0 }
0x1b4a   :  { %v2444_v13 = vsel %vm1115_vm5, %v2442_v9, %v3403_v5  ;;  %v2443_v14 = vsel %vm1115_vm5, %v2441_v8, %v3402_v6 }
0x1b4b   :  { %v2445_v16 = vpack.c.bf16 %v2444_v13, %v2443_v14 }
0x1b4d   :  { %3327 = vmatmul.mubr.msk.bf16.vlgmr.msra.gmra.mxu0 %vm64_vm0, %v2445_v16 }
0x1b4e   :  { %3346 = vmatprep.mubr.msk.bf16.mxu0 %vm3543_vm1, %v3542_v15  ;;  %3339 = vmatpush3.bf16.msra.mxu0 %v3420_v42 }
0x1b4f   :  { %3340 = vmatprep.subr.bf16.mxu0 %v3542_v15 }
0x1b52   :  { %3341 = vmatpush3.bf16.msra.mxu0 %v3421_v32  ;;  %v2989_v32 = vld [vmem:[%s4252_s16 + $0x1] ss:$0 sm:$0xff] }
0x1b53   :  { %3342 = vmatprep.subr.bf16.mxu0 %v3542_v15 }
0x1b56   :  { %3343 = vmatpush3.bf16.msra.mxu0 %v3422_v21 }
0x1b57   :  { %3344 = vmatprep.subr.bf16.mxu0 %v3542_v15 }
0x1b5a   :  { %3345 = vmatpush3.bf16.msra.mxu0 %v3423_v24 }
0x1c0d   :  { %v2508_v12 = vpop.f32.mrf.mxu0 }
0x1c0e   :  { %v2509_v17 = vadd.f32 %v2954_v7, %v2508_v12 }
0x1c0f   :  { %v3328_v19 = vpop.f32.mrf.mxu0 }
0x1c10   :  { %v2515_v20 = vadd.f32 %v2509_v17, %v3959_v10 }
0x1c11   :  { %v2511_v22 = vpop.f32.mrf.mxu0 }
0x1c12   :  { %v2512_v26 = vadd.f32 %v2954_v7, %v2511_v22  ;;  %v2521_v27 = vsel %vm64_vm0, %v2515_v20, 0.0 }
0x1c13   :  { %2522 = vadd.xlane.f32.xlu0 %v2521_v27  ;;  %v3329_v29 = vpop.f32.mrf.mxu0  ;;  %v2980_v27 = vld [vmem:[%s4250_s14 + $0x1] ss:$0 sm:$0xff] }
0x1c14   :  { %v2516_v30 = vadd.f32 %v2512_v26, %v3961_v11  ;;  %v3418_v11 = vld [vmem:[%s4247_s11 + $0x18] sm:$0xff]  }
0x1c15   :  { %3331 = vmatpush3.bf16.msra.mxu1 %v3418_v11 }
0x1c16   :  { %v2524_v34 = vsel %vm64_vm0, %v2516_v30, 0.0  ;;  %3332 = vmatprep.subr.bf16.mxu1 %v3542_v15 }
0x1c17   :  { %2525 = vadd.xlane.f32.xlu1 %v2524_v34 }
0x1c19   :  { %3333 = vmatpush3.bf16.msra.mxu1 %v3419_v18 }
0x1c1a   :  { %3350 = vmatprep.subr.mxu1 %v3542_v15 }
0x1c9c   :  { %v2523_v28 = vpop.xlane.xlu0 %2522 }
0x1c9d   :  { %v2527_v35 = vmul.f32 0.03125, %v2523_v28 }
0x1c9f   :  { %v2529_v36 = vsub.f32 %v2515_v20, %v2527_v35 }
0x1ca0   :  { %v2526_v33 = vpop.xlane.xlu1 %2525 }
0x1ca1   :  { %v2528_v45 = vmul.f32 0.03125, %v2526_v33  ;;  %v2531_v37 = vmul.f32 %v2529_v36, %v2529_v36 }
0x1ca3   :  { %v2530_v39 = vsub.f32 %v2516_v30, %v2528_v45  ;;  %v2533_v10 = vsel %vm64_vm0, %v2531_v37, 0.0 }
0x1ca4   :  { %2534 = vadd.xlane.f32.xlu0 %v2533_v10 }
0x1ca5   :  { %v2532_v40 = vmul.f32 %v2530_v39, %v2530_v39 }
0x1ca7   :  { %v2536_v41 = vsel %vm64_vm0, %v2532_v40, 0.0 }
0x1ca8   :  { %2537 = vadd.xlane.f32.xlu0 %v2536_v41 }
0x1d2d   :  { %v2535_v1 = vpop.xlane.xlu0 %2534 }
0x1d2e   :  { %v2539_v3 = vmul.f32 0.03125, %v2535_v1 }
0x1d30   :  { %v2541_v4 = vadd.f32 1e-12, %v2539_v3 }
0x1d31   :  { %v2538_v43 = vpop.xlane.xlu0 %2537 }
0x1d32   :  { %3504 = vrsqrt.f32 %v2541_v4  ;;  %v2540_v44 = vmul.f32 0.03125, %v2538_v43 }
0x1d34   :  { %v2542_v46 = vadd.f32 1e-12, %v2540_v44 }
0x1d36   :  { %3506 = vrsqrt.f32 %v2542_v46 }
0x1d3f   :  { %v3505_v47 = vpop.eup %3504 }
0x1d40   :  { %v2545_v48 = vmul.f32 %v3505_v47, %v2529_v36 }
0x1d42   :  { %v2553_v51 = vmul.f32 %v2960_v54, %v2545_v48 }
0x1d43   :  { %v3507_v49 = vpop.eup %3506 }
0x1d44   :  { %v2546_v50 = vmul.f32 %v3507_v49, %v2530_v39  ;;  %v2561_v53 = vadd.f32 %v2961_v23, %v2553_v51 }
0x1d46   :  { %v2554_v52 = vmul.f32 %v2960_v54, %v2546_v50 }
0x1d48   :  { %v2562_v31 = vadd.f32 %v2961_v23, %v2554_v52 }
0x1d4a   :  { %v2563_v55 = vpack.c.bf16 %v2562_v31, %v2561_v53 }
0x1d4c   :  { %3335 = vmatmul.mubr.msk.bf16.vlgmr.msra.gmra.mxu1 %vm64_vm0, %v2563_v55 }
0x1d4d   :  { %3354 = vmatprep.mubr.msk.f32.mxu1 %vm3543_vm1, %v3542_v15 }
0x1e0c   :  { %v2626_v56 = vpop.f32.mrf.mxu1 }
0x1e0d   :  { %v2627_v57 = vadd.f32 %v2967_v25, %v2626_v56 }
0x1e0e   :  { %v3336_v58 = vpop.f32.mrf.mxu1 }
0x1e0f   :  { %v2635_v59 = vmul.f32 0.044715, %v2627_v57  ;;  %v2633_v12 = vmul.f32 0.5, %v2627_v57 }
0x1e10   :  { %v2629_v60 = vpop.f32.mrf.mxu1 }
0x1e11   :  { %v2637_v61 = vmul.f32 %v2635_v59, %v2627_v57  ;;  %v2630_v62 = vadd.f32 %v2967_v25, %v2629_v60  ;;  %v2785_v25 = vld [vmem:[%s4238_s2] sm:$0x3] }
0x1e12   :  { %v3337_v63 = vpop.f32.mrf.mxu1 }
0x1e13   :  { %v2639_v0 = vmul.f32 %v2637_v61, %v2627_v57  ;;  %v2636_v38 = vmul.f32 0.044715, %v2630_v62  ;;  %v2634_v17 = vmul.f32 0.5, %v2630_v62 }
0x1e15   :  { %v2641_v2 = vadd.f32 %v2639_v0, %v2627_v57  ;;  %v2638_v5 = vmul.f32 %v2636_v38, %v2630_v62 }
0x1e17   :  { %v2643_v6 = vmul.f32 0.7978846, %v2641_v2  ;;  %v2640_v8 = vmul.f32 %v2638_v5, %v2630_v62 }
0x1e19   :  { %3508 = vtanh.f32 %v2643_v6  ;;  %v2642_v9 = vadd.f32 %v2640_v8, %v2630_v62 }
0x1e1b   :  { %v2644_v13 = vmul.f32 0.7978846, %v2642_v9 }
0x1e1d   :  { %3510 = vtanh.f32 %v2644_v13 }
0x1e26   :  { %v3509_v14 = vpop.eup %3508 }
0x1e27   :  { %v2647_v16 = vadd.f32 1.0, %v3509_v14 }
0x1e29   :  { %v2649_v20 = vmul.f32 %v2647_v16, %v2633_v12 }
0x1e2a   :  { %v3511_v7 = vpop.eup %3510 }
0x1e2b   :  { %v2648_v19 = vadd.f32 1.0, %v3511_v7 }
0x1e2d   :  { %v2650_v22 = vmul.f32 %v2648_v19, %v2634_v17 }
0x1e2f   :  { %v2651_v26 = vpack.c.bf16 %v2650_v22, %v2649_v20 }
0x1e31   :  { %3347 = vmatmul.mubr.msk.bf16.vlgmr.msra.gmra.mxu0 %vm1358_vm6, %v2651_v26 }
0x1ef1   :  { %v2730_v29 = vpop.f32.mrf.mxu0 }
0x1ef2   :  { %v2731_v30 = vadd.f32 %v2980_v27, %v2730_v29 }
0x1ef3   :  { %v3348_v34 = vpop.f32.mrf.mxu0 }
0x1ef4   :  { %v2737_v28 = vadd.f32 %v2731_v30, %v2561_v53  ;;  %v2988_v53 = vld [vmem:[%s4251_s15 + $0x1] ss:$0 sm:$0xff]  ;;  %s3558_s15 = smov [#allocation2]  }
0x1ef5   :  { %v2733_v35 = vpop.f32.mrf.mxu0  ;;  %s2874_s16 = sshll.u32 %s3558_s15, 4  ;;  %s2875_s16 = int_to_ptr.vmem [resolvable:$true] %s2874_s16 }
0x1ef6   :  { %v2734_v36 = vadd.f32 %v2980_v27, %v2733_v35  ;;  %v2743_v33 = vsel %vm64_vm0, %v2737_v28, 0.0  ;;  %s3520_s2 = scalar_lea.vmem %s2875_s16, 32  ;;  %p3525_p1 = scmp.lt.s32.totalorder %s2875_s16, %s2875_s16 }
0x1ef7   :  { %2744 = vadd.xlane.f32.xlu1 %v2743_v33  ;;  %v3349_v45 = vpop.f32.mrf.mxu0  ;;  %p3521_p0 = scmp.ne.s32.totalorder %s2875_s16, %s3520_s2  ;;  %p3526_p2 = scmp.lt.s32.totalorder %s3520_s2, %s3520_s2 }
0x1ef8   :  { %v2738_v37 = vadd.f32 %v2734_v36, %v2562_v31 }
0x1ef9   :  { %p3527_p3 = por %p3526_p2, %p3525_p1 }
0x1efa   :  { %v2746_v39 = vsel %vm64_vm0, %v2738_v37, 0.0 }
0x1efb   :  { %2747 = vadd.xlane.f32.xlu0 %v2746_v39  ;;  %p3528_p4 = pnand %p3527_p3, %p3521_p0 }
0x1f80   :  { %v2745_v10 = vpop.xlane.xlu1 %2744 }
0x1f81   :  { %v2749_v40 = vmul.f32 0.03125, %v2745_v10 }
0x1f83   :  { %v2751_v41 = vsub.f32 %v2737_v28, %v2749_v40 }
0x1f84   :  { %v2748_v11 = vpop.xlane.xlu0 %2747 }
0x1f85   :  { %v2750_v18 = vmul.f32 0.03125, %v2748_v11  ;;  %v2753_v1 = vmul.f32 %v2751_v41, %v2751_v41 }
0x1f87   :  { %v2752_v3 = vsub.f32 %v2738_v37, %v2750_v18  ;;  %v2755_v4 = vsel %vm64_vm0, %v2753_v1, 0.0 }
0x1f88   :  { %2756 = vadd.xlane.f32.xlu1 %v2755_v4 }
0x1f89   :  { %v2754_v43 = vmul.f32 %v2752_v3, %v2752_v3 }
0x1f8b   :  { %v2758_v44 = vsel %vm64_vm0, %v2754_v43, 0.0 }
0x1f8c   :  { %2759 = vadd.xlane.f32.xlu0 %v2758_v44 }
0x2011   :  { %v2757_v46 = vpop.xlane.xlu1 %2756 }
0x2012   :  { %v2761_v47 = vmul.f32 0.03125, %v2757_v46 }
0x2014   :  { %v2763_v48 = vadd.f32 1e-12, %v2761_v47 }
0x2015   :  { %v2760_v54 = vpop.xlane.xlu0 %2759 }
0x2016   :  { %3512 = vrsqrt.f32 %v2763_v48  ;;  %v2762_v49 = vmul.f32 0.03125, %v2760_v54 }
0x2018   :  { %v2764_v50 = vadd.f32 1e-12, %v2762_v49 }
0x201a   :  { %3514 = vrsqrt.f32 %v2764_v50 }
0x2023   :  { %v3513_v51 = vpop.eup %3512 }
0x2024   :  { %v2767_v23 = vmul.f32 %v3513_v51, %v2751_v41 }
0x2026   :  { %v2775_v42 = vmul.f32 %v2988_v53, %v2767_v23 }
0x2027   :  { %v3515_v52 = vpop.eup %3514 }
0x2028   :  { %v2768_v31 = vmul.f32 %v3515_v52, %v2752_v3  ;;  %v2783_v24 = vadd.f32 %v2989_v32, %v2775_v42 }
0x202a   :  { %v2776_v55 = vmul.f32 %v2988_v53, %v2768_v31 }
0x202c   :  { %v2784_v21 = vadd.f32 %v2989_v32, %v2776_v55 }
0x202e   :  { %3351 = vmatpush3.msra.mxu1 %v2784_v21 }
0x202f   :  { %3352 = vmatprep.subr.mxu1 %v3542_v15 }
0x2030   :  { %3353 = vmatpush3.msra.mxu1 %v2783_v24 }
0x2031   :  { %3355 = vmatmul.mubr.msk.f32.vlgmr.msra.gmra.mxu1 %vm1112_vm4, %v2785_v25 }
0x20f1   :  { %v2855_v56 = vpop.f32.mrf.mxu1 }
0x20f2   :  { %v2859_v57 = vmul.f32 %v2855_v56, %v2855_v56 }
0x20f3   :  { %v3356_v58 = vpop.f32.mrf.mxu1 }
0x20f4   :  { %v2861_v59 = vsel %vm2860_vm7, %v2859_v57, 0.0 }
0x20f5   :  { %2862 = vadd.xlane.f32.xlu0 %v2861_v59 }
0x217e   :  { %v2863_v60 = vpop.xlane.xlu0 %2862 }
0x217f   :  { %v2864_v61 = vmax.f32 %v2863_v60, 1e-24 }
0x2181   :  { %3516 = vrsqrt.f32 %v2864_v61 }
0x218e   :  { %v3517_v62 = vpop.eup %3516 }
0x218f   :  { %v2866_v63 = vmul.f32 %v3517_v62, %v2855_v56 }
0x2191   :  { %2867 = vst.msk [vmem:[#allocation2] sm:$0x3] %vm2860_vm7, %v2866_v63 }
0x2192   :  { %3531 = shalt.err (!%p3528_p4)
}
0x2193   :  { %2877 = dma.vmem_to_hbm [thread:$0]  %s2875_s16, 32, %s4253_s17, [#allocation3]  }
0x2194   :  { %3540 = dma.done.wait [#allocation3], 32  }
0x2195   :  { %3541 = vsyncadd [#allocation3], 4294967264 }
0x2196   :  { %2881 = vsyncpa [#allocation3], 1 }

</bundles_post_ra>
